<compile_context>
chip_gen: v7x
topology: tpu7x:2x2x1
jax: 0.10.0
libtpu: 0.0.40
codegen_flags: <defaults>
</compile_context>

<pallas_src>
import functools
import math

import jax
import jax.numpy as jnp
import numpy as np
from jax import lax
from jax.experimental import pallas as pl
from jax.experimental.pallas import tpu as pltpu


# ------------------------------- Pallas kernel --------------------------------

def attention_kernel(x_ref, wqkv_ref, wproj_ref, bproj_ref, o_ref, qkv_ref,
                     *, in_dim, scale, tq):
    """Fused Attention_1 for one (batch, query-tile) grid step.

    x_ref    : (1, N, C)        input tokens (full sequence; re-DMA'd only when b changes)
    wqkv_ref : (C, 3*in_dim)    qkv weight, bf16, pre-transposed to (in, out); qkv_bias=False
    wproj_ref: (in_dim, in_dim) proj weight, bf16, pre-transposed to (in, out)
    bproj_ref: (1, in_dim)      proj bias, f32
    o_ref    : (1, TQ, in_dim)  output tile
    qkv_ref  : (N, 3*in_dim)    f32 VMEM scratch, written once per batch element at qt == 0
    """
    qt = pl.program_id(1)

    # Fused QKV projection, computed once per batch element (qt == 0) and kept in VMEM.
    @pl.when(qt == 0)
    def _():
        x = x_ref[0].astype(jnp.bfloat16)                                  # (N, C)
        qkv_ref[...] = jnp.dot(x, wqkv_ref[...],
                               preferred_element_type=jnp.float32)         # (N, 3*in_dim)

    row0 = pl.multiple_of(qt * tq, tq)
    q = (qkv_ref[pl.ds(row0, tq), :in_dim] * scale).astype(jnp.bfloat16)   # (TQ, in_dim)
    k = qkv_ref[:, in_dim:2 * in_dim].astype(jnp.bfloat16)                 # (N, in_dim)
    v = qkv_ref[:, 2 * in_dim:3 * in_dim]                                  # (N, in_dim) f32

    # scores = (q*scale) @ k^T without materializing an explicit transpose of k.
    s = lax.dot_general(q, k, dimension_numbers=(((1,), (1,)), ((), ())),
                        preferred_element_type=jnp.float32)                # (TQ, N)

    # Max-stabilized softmax, elementwise math in f32 (v5e has no bf16 VPU/EUP).
    m = jnp.max(s, axis=-1, keepdims=True)
    e = jnp.exp(s - m)
    denom = jnp.sum(e, axis=-1, keepdims=True)                             # (TQ, 1)
    # attn_drop(p=0.0) is identity in eval mode.

    # Deferred normalization: (e @ v) * 1/denom   (divide on (TQ,in_dim), via EUP recip).
    o = jnp.dot(e.astype(jnp.bfloat16), v.astype(jnp.bfloat16),
                preferred_element_type=jnp.float32)                        # (TQ, in_dim)
    o = o * pl.reciprocal(denom, approx=True)

    # Output projection (+ bias), proj_drop(identity), residual with v (f32 copy).
    o = jnp.dot(o.astype(jnp.bfloat16), wproj_ref[...],
                preferred_element_type=jnp.float32) + bproj_ref[...]
    v_q = qkv_ref[pl.ds(row0, tq), 2 * in_dim:3 * in_dim]                  # (TQ, in_dim)
    o_ref[0] = (v_q + o).astype(o_ref.dtype)


# ---------------------------------- wrapper ------------------------------------

def attention_1(x, wqkv, wproj, bproj, *, num_heads=1, qk_scale=None, q_tile=None):
    """x: (B, N, C); wqkv: (C, 3*in_dim); wproj: (in_dim, in_dim); bproj: (1, in_dim)."""
    B, N, C = x.shape
    in3 = wqkv.shape[1]
    in_dim = in3 // 3
    # The PyTorch reshape (B, N, 3, num_heads, in_dim) of a 3*in_dim feature vector is
    # only valid for num_heads == 1 (as used in T2T-ViT's token transformer).
    assert num_heads == 1, "Attention_1's reshape requires num_heads == 1"
    # Lane-density / tiling assumptions (other shapes would still be correct but slower).
    assert C % 128 == 0 and in_dim % 128 == 0, "C and in_dim should be multiples of 128"
    head_dim = C // num_heads
    scale = qk_scale if qk_scale is not None else head_dim ** (-0.5)

    tq = q_tile if q_tile is not None else min(N, 256)
    assert N % tq == 0 and tq % 8 == 0, "N must be a multiple of the query tile (mult of 8)"
    n_qt = N // tq

    # Feed the MXU bf16 operands: pre-cast weights once (also halves their DMA traffic).
    wqkv_bf = wqkv.astype(jnp.bfloat16)
    wproj_bf = wproj.astype(jnp.bfloat16)
    bproj_f32 = bproj.astype(jnp.float32).reshape(1, in_dim)

    kernel = functools.partial(attention_kernel, in_dim=in_dim, scale=scale, tq=tq)
    return pl.pallas_call(
        kernel,
        out_shape=jax.ShapeDtypeStruct((B, N, in_dim), x.dtype),
        grid=(B, n_qt),
        in_specs=[
            pl.BlockSpec((1, N, C), lambda b, qt: (b, 0, 0)),        # re-fetched only on b change
            pl.BlockSpec((C, in3), lambda b, qt: (0, 0)),
            pl.BlockSpec((in_dim, in_dim), lambda b, qt: (0, 0)),
            pl.BlockSpec((1, in_dim), lambda b, qt: (0, 0)),
        ],
        out_specs=pl.BlockSpec((1, tq, in_dim), lambda b, qt: (b, qt, 0)),
        scratch_shapes=[pltpu.VMEM((N, in3), jnp.float32)],          # per-batch QKV, carried over qt
        compiler_params=pltpu.CompilerParams(
            dimension_semantics=("parallel", "arbitrary"),
            vmem_limit_bytes=64 * 1024 * 1024,
        ),
    )(x, wqkv_bf, wproj_bf, bproj_f32)


# ------------------------------ pure-JAX reference ------------------------------

def reference_forward(x, wqkv, wproj, bproj, *, num_heads=1):
    B, N, C = x.shape
    in_dim = wqkv.shape[1] // 3
    scale = (C // num_heads) ** (-0.5)
    qkv = x @ wqkv                                   # (B, N, 3*in_dim)
    q, k, v = jnp.split(qkv, 3, axis=-1)             # each (B, N, in_dim)
    attn = jax.nn.softmax((q * scale) @ jnp.swapaxes(k, -1, -2), axis=-1)
    o = attn @ v
    o = o @ wproj + bproj
    return v + o


# ------------------------------------ main --------------------------------------

if __name__ == "__main__":
    # Small, MXU/lane-friendly shapes; N=256 with a 128-row query tile exercises the
    # query-tiled path (2 q-tiles per batch element, QKV scratch reused at qt=1).
    B, N, dim, in_dim, num_heads = 2, 256, 128, 128, 1

    key = jax.random.PRNGKey(0)
    k0, k1, k2, k3 = jax.random.split(key, 4)

    x = jax.random.normal(k0, (B, N, dim), jnp.float32)
    # Weights stored pre-transposed to (in_features, out_features), i.e. nn.Linear.weight.T
    wqkv = jax.random.normal(k1, (dim, 3 * in_dim), jnp.float32) / math.sqrt(dim)
    wproj = jax.random.normal(k2, (in_dim, in_dim), jnp.float32) / math.sqrt(in_dim)
    bproj = 0.02 * jax.random.normal(k3, (1, in_dim), jnp.float32)

    out = attention_1(x, wqkv, wproj, bproj, num_heads=num_heads)
    out = jax.block_until_ready(out)
    assert out.shape == (B, N, in_dim)

    ref = reference_forward(x, wqkv, wproj, bproj, num_heads=num_heads)
    # bf16 MXU operands + approx reciprocal (per perf review) => looser tolerance vs f32 ref.
    np.testing.assert_allclose(np.asarray(out), np.asarray(ref), rtol=5e-2, atol=1e-1)
    print("KERNEL_OK")
</pallas_src>

<mosaic_0001>
module attributes {stable_mosaic.version = 11 : i64} {
  func.func @attention_kernel(%arg0: i32, %arg1: i32, %arg2: memref<1x256x128xf32, #tpu.memory_space<vmem>>, %arg3: memref<128x384xbf16, #tpu.memory_space<vmem>>, %arg4: memref<128x128xbf16, #tpu.memory_space<vmem>>, %arg5: memref<1x128xf32, #tpu.memory_space<vmem>>, %arg6: memref<1x256x128xf32, #tpu.memory_space<vmem>>, %arg7: memref<256x384xf32, #tpu.memory_space<vmem>>) attributes {dimension_semantics = [#tpu.dimension_semantics<parallel>, #tpu.dimension_semantics<arbitrary>], iteration_bounds = array<i64: 2, 1>, scalar_prefetch = 0 : i64, scratch_operands = 1 : i64, tpu.core_type = #tpu.core_type<tc>, window_params = [{transform_indices = @transform_0, window_bounds = array<i64: 1, 256, 128>}, {pipeline_mode = #tpu.pipeline_mode<synchronous>, transform_indices = @transform_1, window_bounds = array<i64: 128, 384>}, {pipeline_mode = #tpu.pipeline_mode<synchronous>, transform_indices = @transform_2, window_bounds = array<i64: 128, 128>}, {pipeline_mode = #tpu.pipeline_mode<synchronous>, transform_indices = @transform_3, window_bounds = array<i64: 1, 128>}, {transform_indices = @transform_4, window_bounds = array<i64: 1, 256, 128>}]} {
    %c0_i32 = arith.constant 0 : i32
    %0 = arith.cmpi eq, %arg1, %c0_i32 : i32
    %1 = arith.extui %0 : i1 to i32
    %c0_i32_0 = arith.constant 0 : i32
    %2 = arith.cmpi ne, %1, %c0_i32_0 : i32
    scf.if %2 {
      %c0_16 = arith.constant 0 : index
      %c0_17 = arith.constant 0 : index
      %c0_18 = arith.constant 0 : index
      %39 = vector.load %arg2[%c0_16, %c0_17, %c0_18] : memref<1x256x128xf32, #tpu.memory_space<vmem>>, vector<1x256x128xf32>
      %40 = vector.shape_cast %39 : vector<1x256x128xf32> to vector<256x128xf32>
      %41 = arith.truncf %40 : vector<256x128xf32> to vector<256x128xbf16>
      %c0_19 = arith.constant 0 : index
      %c0_20 = arith.constant 0 : index
      %42 = vector.load %arg3[%c0_19, %c0_20] : memref<128x384xbf16, #tpu.memory_space<vmem>>, vector<128x384xbf16>
      %cst_21 = arith.constant dense<0.000000e+00> : vector<256x384xf32>
      %43 = tpu.matmul %41, %42, %cst_21 {dimension_numbers = #tpu.dot_dimension_numbers<[1], [0], [0], [1], [0, 0, 1, 1], [], []>} : vector<256x128xbf16>, vector<128x384xbf16>, vector<256x384xf32> -> vector<256x384xf32>
      %c0_22 = arith.constant 0 : index
      %c0_23 = arith.constant 0 : index
      %44 = vector.load %arg7[%c0_22, %c0_23] : memref<256x384xf32, #tpu.memory_space<vmem>>, vector<256x384xf32>
      tpu.vector_store %arg7[%c0_22, %c0_23], %43 {strides = array<i32>} : memref<256x384xf32, #tpu.memory_space<vmem>>, vector<256x384xf32>,
    } else {
    }
    %c256_i32 = arith.constant 256 : i32
    %3 = arith.muli %arg1, %c256_i32 : i32
    %4 = tpu.assume_multiple %3, 256 : i32
    %5 = arith.index_cast %4 : i32 to index
    %c0 = arith.constant 0 : index
    %6 = vector.load %arg7[%5, %c0] : memref<256x384xf32, #tpu.memory_space<vmem>>, vector<256x128xf32>
    %cst = arith.constant 0.0883883461 : f32
    %7 = vector.broadcast %cst : f32 to vector<256x128xf32>
    %8 = arith.mulf %6, %7 : vector<256x128xf32>
    %9 = arith.truncf %8 : vector<256x128xf32> to vector<256x128xbf16>
    %c0_1 = arith.constant 0 : index
    %c128 = arith.constant 128 : index
    %10 = vector.load %arg7[%c0_1, %c128] : memref<256x384xf32, #tpu.memory_space<vmem>>, vector<256x128xf32>
    %11 = arith.truncf %10 : vector<256x128xf32> to vector<256x128xbf16>
    %c0_2 = arith.constant 0 : index
    %c256 = arith.constant 256 : index
    %12 = vector.load %arg7[%c0_2, %c256] : memref<256x384xf32, #tpu.memory_space<vmem>>, vector<256x128xf32>
    %cst_3 = arith.constant dense<0.000000e+00> : vector<256x256xf32>
    %13 = tpu.matmul %9, %11, %cst_3 {dimension_numbers = #tpu.dot_dimension_numbers<[1], [1], [0], [0], [0, 0, 1, 0], [], []>} : vector<256x128xbf16>, vector<256x128xbf16>, vector<256x256xf32> -> vector<256x256xf32>
    %cst_4 = arith.constant dense<0xFF800000> : vector<256xf32>
    %14 = vector.multi_reduction <maximumf>, %13, %cst_4 [1] : vector<256x256xf32> to vector<256xf32>
    %15 = vector.shape_cast %14 : vector<256xf32> to vector<256x1xf32>
    %16 = vector.broadcast %15 : vector<256x1xf32> to vector<256x256xf32>
    %17 = arith.subf %13, %16 : vector<256x256xf32>
    %18 = math.exp %17 : vector<256x256xf32>
    %cst_5 = arith.constant dense<0.000000e+00> : vector<256xf32>
    %19 = vector.multi_reduction <add>, %18, %cst_5 [1] : vector<256x256xf32> to vector<256xf32>
    %20 = vector.shape_cast %19 : vector<256xf32> to vector<256x1xf32>
    %21 = arith.truncf %18 : vector<256x256xf32> to vector<256x256xbf16>
    %22 = arith.truncf %12 : vector<256x128xf32> to vector<256x128xbf16>
    %cst_6 = arith.constant dense<0.000000e+00> : vector<256x128xf32>
    %23 = tpu.matmul %21, %22, %cst_6 {dimension_numbers = #tpu.dot_dimension_numbers<[1], [0], [0], [1], [0, 0, 1, 1], [], []>} : vector<256x256xbf16>, vector<256x128xbf16>, vector<256x128xf32> -> vector<256x128xf32>
    %24 = tpu.reciprocal %20 {approx = true} : vector<256x1xf32> -> vector<256x1xf32>
    %25 = vector.broadcast %24 : vector<256x1xf32> to vector<256x128xf32>
    %26 = arith.mulf %23, %25 : vector<256x128xf32>
    %27 = arith.truncf %26 : vector<256x128xf32> to vector<256x128xbf16>
    %c0_7 = arith.constant 0 : index
    %c0_8 = arith.constant 0 : index
    %28 = vector.load %arg4[%c0_7, %c0_8] : memref<128x128xbf16, #tpu.memory_space<vmem>>, vector<128x128xbf16>
    %cst_9 = arith.constant dense<0.000000e+00> : vector<256x128xf32>
    %29 = tpu.matmul %27, %28, %cst_9 {dimension_numbers = #tpu.dot_dimension_numbers<[1], [0], [0], [1], [0, 0, 1, 1], [], []>} : vector<256x128xbf16>, vector<128x128xbf16>, vector<256x128xf32> -> vector<256x128xf32>
    %c0_10 = arith.constant 0 : index
    %c0_11 = arith.constant 0 : index
    %30 = vector.load %arg5[%c0_10, %c0_11] : memref<1x128xf32, #tpu.memory_space<vmem>>, vector<1x128xf32>
    %31 = vector.broadcast %30 : vector<1x128xf32> to vector<256x128xf32>
    %32 = arith.addf %29, %31 : vector<256x128xf32>
    %33 = arith.index_cast %4 : i32 to index
    %c256_12 = arith.constant 256 : index
    %34 = vector.load %arg7[%33, %c256_12] : memref<256x384xf32, #tpu.memory_space<vmem>>, vector<256x128xf32>
    %35 = arith.addf %34, %32 : vector<256x128xf32>
    %c0_13 = arith.constant 0 : index
    %c0_14 = arith.constant 0 : index
    %c0_15 = arith.constant 0 : index
    %36 = vector.load %arg6[%c0_13, %c0_14, %c0_15] : memref<1x256x128xf32, #tpu.memory_space<vmem>>, vector<1x256x128xf32>
    %37 = vector.shape_cast %36 : vector<1x256x128xf32> to vector<256x128xf32>
    %38 = vector.shape_cast %35 : vector<256x128xf32> to vector<1x256x128xf32>
    tpu.vector_store %arg6[%c0_13, %c0_14, %c0_15], %38 {strides = array<i32>} : memref<1x256x128xf32, #tpu.memory_space<vmem>>, vector<1x256x128xf32>,
    return
  }
  func.func @transform_0(%arg0: i32, %arg1: i32) -> (i32, i32, i32) {
    %c0_i32 = arith.constant 0 : i32
    %c0_i32_0 = arith.constant 0 : i32
    %c0_i32_1 = arith.constant 0 : i32
    return %arg0, %c0_i32, %c0_i32_0 : i32, i32, i32
  }
  func.func @transform_1(%arg0: i32, %arg1: i32) -> (i32, i32) {
    %c0_i32 = arith.constant 0 : i32
    %c0_i32_0 = arith.constant 0 : i32
    %c0_i32_1 = arith.constant 0 : i32
    return %c0_i32, %c0_i32_0 : i32, i32
  }
  func.func @transform_2(%arg0: i32, %arg1: i32) -> (i32, i32) {
    %c0_i32 = arith.constant 0 : i32
    %c0_i32_0 = arith.constant 0 : i32
    %c0_i32_1 = arith.constant 0 : i32
    return %c0_i32, %c0_i32_0 : i32, i32
  }
  func.func @transform_3(%arg0: i32, %arg1: i32) -> (i32, i32) {
    %c0_i32 = arith.constant 0 : i32
    %c0_i32_0 = arith.constant 0 : i32
    %c0_i32_1 = arith.constant 0 : i32
    return %c0_i32, %c0_i32_0 : i32, i32
  }
  func.func @transform_4(%arg0: i32, %arg1: i32) -> (i32, i32, i32) {
    %c0_i32 = arith.constant 0 : i32
    %c0_i32_0 = arith.constant 0 : i32
    return %arg0, %arg1, %c0_i32 : i32, i32, i32
  }
}

</mosaic_0001>

<bundles_post_ra>
// kernel: tpu_custom_call.1
= control target key start
LH: loop header
LB: loop body
LE: loop exit
PB: predicated region body
PF: predicated region fallthrough
CT: control target
= control target key end

     0   :  { %s4290_s0 = inlined_call_operand.hbm [shape: f32[2,256,128], index: 0, kind: input, shape index: {}]   ;;  %s4291_s1 = inlined_call_operand.hbm [shape: bf16[128,384], index: 1, kind: input, shape index: {}]   ;;  %s4292_s2 = inlined_call_operand.hbm [shape: bf16[128,128], index: 2, kind: input, shape index: {}]   ;;  %s4293_s3 = inlined_call_operand.hbm [shape: f32[1,128], index: 3, kind: input, shape index: {}]   ;;  %s4294_s4 = inlined_call_operand.hbm [shape: f32[2,256,128], index: 4, kind: output, shape index: {}]  }
   0x1   :  { %4344 = sst [smem:[#allocation61_spill]] %s4291_s1 }
   0x2   :  { %9 = vsyncpa [#allocation4], 0 }
   0x3   :  { %11 = vsyncpa [#allocation4 + $0x1], 0 }
   0x4   :  { %12 = vsyncpa [#allocation7], 0 }
   0x5   :  { %13 = vsyncpa [#allocation10], 0 }
   0x6   :  { %14 = vsyncpa [#allocation5], 0 }
   0x7   :  { %16 = vsyncpa [#allocation5 + $0x1], 0  ;;  %s3366_s15 = smov 0   ;;  %s3368_s16 = smov 0  }
   0x8   :  { %s3370_s17 = smov 0   ;;  %s3372_s18 = smov 0  }
   0x9   :  { %s3374_s19 = smov 0   ;;  %s3376_s20 = smov 0  }
   0xa LB: > { %s2427_s21 = sadd.s32 4294967295, %s3325_s20   ;;  %s2428_s22 = sadd.s32 4294967294, %s3325_s20   ;;  %s3325_s20 = sphi %s3376_s20, %s22_s20   ;;  %s3321_s19 = sphi %s3374_s19, %s4456_s19   ;;  %s3317_s18 = sphi %s3372_s18, %s4455_s18   ;;  %s3313_s17 = sphi %s3370_s17, %s4454_s17   ;;  %s3309_s16 = sphi %s3368_s16, %s4453_s16   ;;  %s3305_s15 = sphi %s3366_s15, %s4452_s15  }
   0xb   : > { %p54_p0 = scmp.ne.s32.totalorder %s3309_s16, %s3305_s15  ;;  %p3400_p1 = scmp.eq.s32.totalorder %s2427_s21, 0 }
   0xc   : > { %p3404_p2 = scmp.eq.s32.totalorder %s2427_s21, 1  ;;  %p149_p3 = scmp.eq.s32.totalorder %s2428_s22, 1 }
   0xd   : > { %s4345_s23 = scalar_select %p3400_p1, 1, 0 }
   0xe   : > { %s4346_s24 = scalar_select %p3404_p2, 1, 0 }
   0xf   : > { %p3410_p4 = por %p3400_p1, %p54_p0  ;;  %p2429_p5 = scmp.ge.s32.totalorder %s3325_s20, 1 }
  0x10   : > { %p3415_p6 = por %p149_p3, %p54_p0  ;;  %p156_p7 = scmp.lt.s32.totalorder %s3325_s20, 3 }
  0x11   : > { %s4347_s25 = scalar_select %p3410_p4, 1, 0 }
  0x12   : > { %s4348_s26 = scalar_select %p3415_p6, 1, 0 }
  0x13   : > { %p3420_p8 = pnand %p2429_p5, %p156_p7  ;;  %s3327_s28 = smov [#allocation6]  }
  0x14   : > { %s168_s29 = sshll.u32 %s3327_s28, 4  ;;  %s3328_s5 = smov [#allocation8]   ;;  %s3424_s29 = int_to_ptr.vmem [resolvable:$true] %s168_s29 }
  0x15   : > { %s4349_s27 = scalar_select %p3420_p8, 1, 0 }
  0x16   : > { %p2803_p9 = pneg %p3420_p8  ;;  %s181_s6 = sshll.u32 %s3328_s5, 4  ;;  %s3435_s6 = int_to_ptr.vmem [resolvable:$true] %s181_s6 }
  0x17   : > { %s4351_s1 = sld [smem:[#allocation61_spill]] }
  0x18   : > { %p3431_p11 = pnand %p2803_p9, %p3400_p1 }
  0x1a   : > { %p3445_p13 = pneg %p3431_p11 }
  0x1d   : > { %s3121_s9 = scalar_lea.hbm %s4351_s1, 3072 }
  0x1e   : > { %p3122_p12 = scmp.ne.s32.totalorder %s4351_s1, %s3121_s9  ;;  %p3128_p5 = scmp.lt.u32.totalorder %s3121_s9, %s4351_s1 }
  0x20   : > { %p3124_p0 = pnand %p3445_p13, %p3122_p12 }
  0x22   : > { %p3125_p3 = pneg %p3124_p0 }
  0x24   : > { %p3130_p7 = pnand %p3128_p5, %p3125_p3 }
  0x26   : > { %3133 = shalt.err (!%p3130_p7)
}
  0x27   : > { %s3134_s21 = scalar_lea.vmem %s3424_s29, 3072  ;;  %p3142_p1 = scmp.lt.s32.totalorder %s3424_s29, %s3424_s29 }
  0x28   : > { %p3135_p9 = scmp.ne.s32.totalorder %s3424_s29, %s3134_s21  ;;  %p3143_p4 = scmp.lt.s32.totalorder %s3134_s21, %s3134_s21 }
  0x2a   : > { %p3137_p10 = pnand %p3135_p9, %p3445_p13  ;;  %p3144_p12 = por %p3143_p4, %p3142_p1 }
  0x2c   : > { %p3138_p6 = pneg %p3137_p10 }
  0x2e   : > { %p3145_p0 = pnand %p3144_p12, %p3138_p6 }
  0x30   : > { %3148 = shalt.err (!%p3145_p0)
}
  0x31   : > { %s3329_s22 = smov 192   ;;  %s3330_s28 = smov 12  }
  0x32   : > { %2806 = dma.hbm_to_vmem [thread:$0]  (!%p3431_p11), %s4351_s1, 3072, %s3424_s29, [#allocation7], %s3329_s22, %s3329_s22, %s3330_s28  }
  0x33   : > { %s3149_s10 = scalar_lea.hbm %s4292_s2, 1024 }
  0x34   : > { %p3150_p1 = scmp.ne.s32.totalorder %s4292_s2, %s3149_s10  ;;  %p3156_p10 = scmp.lt.u32.totalorder %s3149_s10, %s4292_s2 }
  0x36   : > { %p3152_p4 = pnand %p3150_p1, %p3445_p13 }
  0x38   : > { %p3153_p6 = pneg %p3152_p4 }
  0x3a   : > { %p3158_p3 = pnand %p3156_p10, %p3153_p6 }
  0x3c   : > { %3161 = shalt.err (!%p3158_p3)
}
  0x3d   : > { %s3162_s29 = scalar_lea.vmem %s3435_s6, 1024  ;;  %p3170_p12 = scmp.lt.s32.totalorder %s3435_s6, %s3435_s6 }
  0x3e   : > { %p3163_p5 = scmp.ne.s32.totalorder %s3435_s6, %s3162_s29  ;;  %p3171_p0 = scmp.lt.s32.totalorder %s3162_s29, %s3162_s29 }
  0x40   : > { %p3165_p7 = pnand %p3163_p5, %p3445_p13  ;;  %p3172_p1 = por %p3171_p0, %p3170_p12 }
  0x42   : > { %p3166_p9 = pneg %p3165_p7 }
  0x44   : > { %p3173_p4 = pnand %p3172_p1, %p3166_p9 }
  0x46   : > { %3176 = shalt.err (!%p3173_p4)
}
  0x47   : > { %s3331_s22 = smov 64   ;;  %s3332_s28 = smov 4  }
  0x48   : > { %2809 = dma.hbm_to_vmem [thread:$0]  (!%p3431_p11), %s4292_s2, 1024, %s3435_s6, [#allocation7], %s3331_s22, %s3331_s22, %s3332_s28  }
  0x49   : > { %s3333_s8 = smov [#allocation9]   ;;  %s3177_s13 = scalar_lea.hbm %s4293_s3, 16 }
  0x4a   : > { %s195_s9 = sshll.u32 %s3333_s8, 4  ;;  %p3178_p6 = scmp.ne.s32.totalorder %s4293_s3, %s3177_s13  ;;  %s196_s9 = int_to_ptr.vmem [resolvable:$true] %s195_s9 }
  0x4b   : > { %p3184_p5 = scmp.lt.u32.totalorder %s3177_s13, %s4293_s3 }
  0x4c   : > { %p3180_p10 = pnand %p3178_p6, %p3445_p13 }
  0x4e   : > { %p3181_p3 = pneg %p3180_p10 }
  0x50   : > { %p3186_p7 = pnand %p3184_p5, %p3181_p3 }
  0x52   : > { %3189 = shalt.err (!%p3186_p7)
}
  0x53   : > { %s3190_s6 = scalar_lea.vmem %s196_s9, 16  ;;  %s3197_s22 = scalar_lea.vmem %s196_s9, 32 }
  0x54   : > { %p3191_p9 = scmp.ne.s32.totalorder %s196_s9, %s3190_s6  ;;  %p3198_p1 = scmp.lt.s32.totalorder %s196_s9, %s196_s9 }
  0x55   : > { %p3199_p4 = scmp.lt.s32.totalorder %s3197_s22, %s3190_s6 }
  0x56   : > { %p3193_p12 = pnand %p3191_p9, %p3445_p13 }
  0x57   : > { %p3200_p8 = por %p3199_p4, %p3198_p1 }
  0x58   : > { %p3194_p0 = pneg %p3193_p12 }
  0x5a   : > { %p3201_p2 = pnand %p3200_p8, %p3194_p0 }
  0x5c   : > { %3204 = shalt.err (!%p3201_p2)
}
  0x5d   : > { %2812 = dma.hbm_to_vmem [thread:$0]  (!%p3431_p11), %s4293_s3, 16, %s196_s9, [#allocation10]  }
  0x5e   : > { %s34_s1 = sadd.s32 1, %s3321_s19  ;;  %s41_s12 = sadd.s32 1, %s3313_s17 }
  0x5f   : > { %p36_p8 = scmp.ge.s32.totalorder %s34_s1, 2  ;;  %p48_p2 = scmp.ne.s32.totalorder %s3313_s17, %s3309_s16 }
  0x60   : > { %p49_p13 = scmp.eq.s32.totalorder %s3325_s20, 0  ;;  %p4354_p10 = scmp.ne.s32.totalorder %s4346_s24, 0 }
  0x61   : > { %s4458_s1 = smov (%p36_p8, %s34_s1), 0  ;;  %p2824_p11 = scmp.lt.s32.totalorder %s3325_s20, 2 }
  0x62   : > { %p3514_p6 = por %p49_p13, %p48_p2  ;;  %p3520_p3 = por %p4354_p10, %p48_p2 }
  0x63   : > { %s38_s8 = ssub.s32 %s3321_s19, %s4458_s1  ;;  %s206_s9 = sand.u32 1, %s3313_s17  }
  0x64   : > { %p39_p5 = scmp.eq.s32.totalorder %s38_s8, 0  ;;  %s2434_s10 = sshll.u32 %s206_s9, 8 }
  0x65   : > { %s2481_s13 = sshll.u32 %s3321_s19, 12  ;;  %s210_s24 = scalar_lea.vmem [#allocation3], %s2434_s10 }
  0x66   : > { %s3529_s11 = scalar_select %p39_p5, %s3313_s17, %s41_s12  }
  0x67   : > { %s3535_s29 = scalar_lea.hbm %s4290_s0, %s2481_s13  ;;  %s217_s6 = sshll.u32 %s210_s24, 4  ;;  %s3537_s6 = int_to_ptr.vmem [resolvable:$true] %s217_s6 }
  0x68   : > { %p3541_p7 = pnand %p2824_p11, %p3514_p6  ;;  %s3545_s28 = scalar_lea.sflag [#allocation4], %s206_s9 }
  0x69   : > { %s3205_s5 = scalar_lea.hbm %s3535_s29, 4096  ;;  %s3210_s30 = scalar_lea.hbm %s4290_s0, 8192 }
  0x6a   : > { %p3206_p9 = scmp.ne.s32.totalorder %s3535_s29, %s3205_s5  ;;  %p3207_p12 = pneg %p3541_p7 }
  0x6b   : > { %p3211_p4 = scmp.lt.u32.totalorder %s3535_s29, %s4290_s0  ;;  %p3212_p8 = scmp.lt.u32.totalorder %s3210_s30, %s3205_s5 }
  0x6c   : > { %p3208_p0 = pnand %p3207_p12, %p3206_p9  ;;  %p3214_p13 = scmp.lt.u32.totalorder %s3205_s5, %s3535_s29 }
  0x6d   : > { %p3213_p2 = por %p3212_p8, %p3211_p4 }
  0x6e   : > { %p3209_p1 = pneg %p3208_p0 }
  0x6f   : > { %p3215_p6 = por %p3214_p13, %p3213_p2 }
  0x71   : > { %p3216_p10 = pnand %p3215_p6, %p3209_p1 }
  0x73   : > { %3219 = shalt.err (!%p3216_p10)
}
  0x74   : > { %s3220_s9 = scalar_lea.vmem %s3537_s6, 4096  ;;  %s3334_s14 = smov [#allocation3]  }
  0x75   : > { %p3221_p11 = scmp.ne.s32.totalorder %s3537_s6, %s3220_s9  ;;  %s3225_s21 = sshll.u32 %s3334_s14, 4  ;;  %s3226_s21 = int_to_ptr.vmem [resolvable:$false] %s3225_s21 }
  0x76   : > { %s3227_s24 = scalar_lea.vmem %s3226_s21, 8192  ;;  %p3228_p0 = scmp.lt.s32.totalorder %s3537_s6, %s3226_s21 }
  0x77   : > { %p3223_p5 = pnand %p3221_p11, %p3207_p12  ;;  %p3229_p4 = scmp.lt.s32.totalorder %s3227_s24, %s3220_s9 }
  0x79   : > { %p3224_p9 = pneg %p3223_p5  ;;  %p3230_p8 = por %p3229_p4, %p3228_p0 }
  0x7b   : > { %p3231_p2 = pnand %p3230_p8, %p3224_p9 }
  0x7d   : > { %3234 = shalt.err (!%p3231_p2)
}
  0x7e   : > { %s3335_s5 = smov 128   ;;  %s3336_s12 = smov 8  }
  0x7f   : > { %2816 = dma.hbm_to_vmem [thread:$0]  (!%p3541_p7), %s3535_s29, 4096, %s3537_s6, %s3545_s28, %s3335_s5, %s3335_s5, %s3336_s12  }
  0x80   : > { %p4357_p12 = scmp.ne.s32.totalorder %s4349_s27, 0 }
  0x82   : > { %229 = sbr.rel (%p4357_p12) target bundleno = 1479 (0x5c7), region = 36 }
  0x89   : > { %s3576_s8 = sand.u32 1, %s3309_s16   ;;  %p4358_p1 = scmp.ne.s32.totalorder %s4347_s25, 0 }
  0x8a   : > { %s2438_s30 = sshll.u32 %s3576_s8, 8  ;;  %s232_s10 = scalar_lea.sflag [#allocation4], %s3576_s8 }
  0x8b   : > { %s3582_s13 = scalar_lea.vmem [#allocation3], %s2438_s30 }
  0x8c   : > { %3288 = dma.done.wait (%p4358_p1), %s232_s10, 4096  }
  0x8d   : > { %3290 = vsyncadd (%p4358_p1), %s232_s10, 4294963200  ;;  %p4359_p7 = scmp.ne.s32.totalorder %s4345_s23, 0 }
  0x8f   : > { %3292 = dma.done.wait (%p4359_p7), [#allocation7], 4096  }
  0x90   : > { %3294 = vsyncadd (%p4359_p7), [#allocation7], 4294963200 }
  0x91   : > { %3296 = dma.done.wait (%p4359_p7), [#allocation10], 16  }
  0x92   : > { %3298 = vsyncadd (%p4359_p7), [#allocation10], 4294967280  ;;  %v3337_v0 = vmov 0   ;;  %v2889_v1 = vld [vmem:[#allocation6 + $0x4] ss:$12 sps:$4 sm:$0xff]   ;;  %v279_v10 = vld [vmem:[%s3582_s13 + $0x8] sm:$0xff] }
  0x93   : > { %518 = vmatprep.mubr.bf16.mxu0 %v3337_v0  ;;  %v2891_v2 = vld [vmem:[#allocation6] ss:$12 sps:$4 sm:$0xff]   ;;  %486 = vmatprep.subr.bf16.mxu0 %v2889_v1  ;;  %v2892_v3 = vld [vmem:[#allocation6 + $0x1c] ss:$12 sps:$4 sm:$0xff]   ;;  %v2894_v4 = vld [vmem:[#allocation6 + $0x18] ss:$12 sps:$4 sm:$0xff]  }
  0x94   : > { %487 = vmatpush1.bf16.msra.mxu0 %v2891_v2  ;;  %v2895_v5 = vld [vmem:[#allocation6 + $0x34] ss:$12 sps:$4 sm:$0xff]   ;;  %v2897_v6 = vld [vmem:[#allocation6 + $0x30] ss:$12 sps:$4 sm:$0xff]   ;;  %v2898_v7 = vld [vmem:[#allocation6 + $0x4c] ss:$12 sps:$4 sm:$0xff]  }
  0x95   : > { %488 = vmatprep.subr.bf16.mxu0 %v2892_v3  ;;  %v278_v8 = vld [vmem:[%s3582_s13] sm:$0xff]  ;;  %v2900_v9 = vld [vmem:[#allocation6 + $0x48] ss:$12 sps:$4 sm:$0xff]   ;;  %v2909_v17 = vld [vmem:[#allocation6 + $0x90] ss:$12 sps:$4 sm:$0xff]   ;;  %s4142_s23 = scalar_lea.vmem [#allocation11], %s2438_s30 }
  0x96   : > { %v2901_v11 = vld [vmem:[#allocation6 + $0x64] ss:$12 sps:$4 sm:$0xff]   ;;  %v310_v12 = vpack.c.bf16 %v279_v10, %v278_v8  ;;  %v2903_v13 = vld [vmem:[#allocation6 + $0x60] ss:$12 sps:$4 sm:$0xff]   ;;  %v2904_v14 = vld [vmem:[#allocation6 + $0x7c] ss:$12 sps:$4 sm:$0xff]  }
  0x97   : > { %v2906_v15 = vld [vmem:[#allocation6 + $0x78] ss:$12 sps:$4 sm:$0xff]   ;;  %v2907_v16 = vld [vmem:[#allocation6 + $0x94] ss:$12 sps:$4 sm:$0xff]   ;;  %v2916_v23 = vld [vmem:[#allocation6 + $0x50] ss:$12 sps:$4 sm:$0xff]  }
  0x98   : > { %489 = vmatpush1.bf16.msra.mxu0 %v2894_v4  ;;  %2707 = vmatprep.mubr.bf16.mxu1 %v310_v12  ;;  %v2910_v18 = vld [vmem:[#allocation6 + $0xac] ss:$12 sps:$4 sm:$0xff]   ;;  %v2913_v19 = vld [vmem:[#allocation6 + $0x8] ss:$12 sps:$4 sm:$0xff]   ;;  %v282_v29 = vld [vmem:[%s3582_s13 + $0x20] sm:$0xff]  ;;  %s2482_s25 = sshll.u32 %s3317_s18, 12 }
  0x99   : > { %490 = vmatprep.subr.bf16.mxu0 %v2895_v5  ;;  %v2914_v20 = vld [vmem:[#allocation6 + $0x20] ss:$12 sps:$4 sm:$0xff]   ;;  %v2912_v21 = vld [vmem:[#allocation6 + $0xa8] ss:$12 sps:$4 sm:$0xff]   ;;  %2691 = vmatprep.subr.bf16.mxu1 %v2913_v19  ;;  %v2915_v22 = vld [vmem:[#allocation6 + $0x38] ss:$12 sps:$4 sm:$0xff]   ;;  %s4235_s22 = scalar_lea.hbm %s4294_s4, %s2482_s25 }
  0x9a   : > { %2692 = vmatpush3.bf16.msra.mxu1 %v2913_v19  ;;  %v280_v24 = vld [vmem:[%s3582_s13 + $0x10] sm:$0xff]  ;;  %v281_v25 = vld [vmem:[%s3582_s13 + $0x18] sm:$0xff]  ;;  %v2918_v28 = vld [vmem:[#allocation6 + $0x80] ss:$12 sps:$4 sm:$0xff]   ;;  %s2312_s27 = sshll.u32 %s4142_s23, 4  ;;  %s2297_s18 = scalar_lea.sflag [#allocation5], %s3576_s8  ;;  %s4237_s27 = int_to_ptr.vmem [resolvable:$true] %s2312_s27 }
  0x9b   : > { %2693 = vmatprep.subr.bf16.mxu1 %v2914_v20  ;;  %v311_v26 = vpack.c.bf16 %v281_v25, %v280_v24  ;;  %v2917_v27 = vld [vmem:[#allocation6 + $0x68] ss:$12 sps:$4 sm:$0xff]   ;;  %v2919_v32 = vld [vmem:[#allocation6 + $0x98] ss:$12 sps:$4 sm:$0xff]   ;;  %v2920_v33 = vld [vmem:[#allocation6 + $0xb0] ss:$12 sps:$4 sm:$0xff]  }
  0x9c   : > { %491 = vmatpush1.bf16.msra.mxu0 %v2897_v6  ;;  %v283_v30 = vld [vmem:[%s3582_s13 + $0x28] sm:$0xff]  ;;  %v284_v34 = vld [vmem:[%s3582_s13 + $0x30] sm:$0xff]  ;;  %v285_v35 = vld [vmem:[%s3582_s13 + $0x38] sm:$0xff]  ;;  %s3235_s28 = scalar_lea.vmem %s4237_s27, 4096  ;;  %s3338_s9 = smov [#allocation11]  }
  0x9d   : > { %492 = vmatprep.subr.bf16.mxu0 %v2898_v7  ;;  %v312_v31 = vpack.c.bf16 %v283_v30, %v282_v29  ;;  %v313_v36 = vpack.c.bf16 %v285_v35, %v284_v34  ;;  %v286_v37 = vld [vmem:[%s3582_s13 + $0x40] sm:$0xff]  ;;  %v287_v38 = vld [vmem:[%s3582_s13 + $0x48] sm:$0xff]  ;;  %v288_v40 = vld [vmem:[%s3582_s13 + $0x50] sm:$0xff]  ;;  %p3236_p13 = scmp.ne.s32.totalorder %s4237_s27, %s3235_s28  ;;  %s3239_s14 = sshll.u32 %s3338_s9, 4  ;;  %s3240_s14 = int_to_ptr.vmem [resolvable:$false] %s3239_s14 }
  0x9e   : > { %2694 = vmatpush3.bf16.msra.mxu1 %v2914_v20  ;;  %v314_v39 = vpack.c.bf16 %v287_v38, %v286_v37  ;;  %v289_v41 = vld [vmem:[%s3582_s13 + $0x58] sm:$0xff]  ;;  %v290_v43 = vld [vmem:[%s3582_s13 + $0x60] sm:$0xff]  ;;  %v291_v44 = vld [vmem:[%s3582_s13 + $0x68] sm:$0xff]  ;;  %s3241_s21 = scalar_lea.vmem %s3240_s14, 8192  ;;  %p3242_p11 = scmp.lt.s32.totalorder %s4237_s27, %s3240_s14 }
  0x9f   : > { %2695 = vmatprep.subr.bf16.mxu1 %v2915_v22  ;;  %v315_v42 = vpack.c.bf16 %v289_v41, %v288_v40  ;;  %v316_v45 = vpack.c.bf16 %v291_v44, %v290_v43  ;;  %v292_v46 = vld [vmem:[%s3582_s13 + $0x70] sm:$0xff]  ;;  %v293_v47 = vld [vmem:[%s3582_s13 + $0x78] sm:$0xff]  ;;  %v294_v48 = vld [vmem:[%s3582_s13 + $0x80] sm:$0xff]  ;;  %p3237_p6 = pnand %p3236_p13, %p3520_p3  ;;  %p3243_p5 = scmp.lt.s32.totalorder %s3241_s21, %s3235_s28 }
  0xa0   : > { %493 = vmatpush1.bf16.msra.mxu0 %v2900_v9  ;;  %v295_v49 = vld [vmem:[%s3582_s13 + $0x88] sm:$0xff]  ;;  %v317_v50 = vpack.c.bf16 %v293_v47, %v292_v46  ;;  %v296_v52 = vld [vmem:[%s3582_s13 + $0x90] sm:$0xff]  ;;  %v297_v53 = vld [vmem:[%s3582_s13 + $0x98] sm:$0xff] }
  0xa1   : > { %494 = vmatprep.subr.bf16.mxu0 %v2901_v11  ;;  %v318_v51 = vpack.c.bf16 %v295_v49, %v294_v48  ;;  %v298_v54 = vld [vmem:[%s3582_s13 + $0xa0] sm:$0xff]  ;;  %v299_v55 = vld [vmem:[%s3582_s13 + $0xa8] sm:$0xff]  ;;  %v319_v56 = vpack.c.bf16 %v297_v53, %v296_v52  ;;  %v300_v58 = vld [vmem:[%s3582_s13 + $0xb0] sm:$0xff]  ;;  %p3238_p10 = pneg %p3237_p6  ;;  %p3244_p9 = por %p3243_p5, %p3242_p11 }
  0xa2   : > { %2696 = vmatpush3.bf16.msra.mxu1 %v2915_v22  ;;  %v320_v57 = vpack.c.bf16 %v299_v55, %v298_v54  ;;  %v301_v59 = vld [vmem:[%s3582_s13 + $0xb8] sm:$0xff]  ;;  %v302_v60 = vld [vmem:[%s3582_s13 + $0xc0] sm:$0xff]  ;;  %v303_v61 = vld [vmem:[%s3582_s13 + $0xc8] sm:$0xff] }
  0xa3   : > { %2697 = vmatprep.subr.bf16.mxu1 %v2916_v23  ;;  %v321_v62 = vpack.c.bf16 %v301_v59, %v300_v58  ;;  %v322_v63 = vpack.c.bf16 %v303_v61, %v302_v60  ;;  %v304_v1 = vld [vmem:[%s3582_s13 + $0xd0] sm:$0xff]  ;;  %v305_v2 = vld [vmem:[%s3582_s13 + $0xd8] sm:$0xff]  ;;  %v306_v3 = vld [vmem:[%s3582_s13 + $0xe0] sm:$0xff]  ;;  %p3245_p0 = pnand %p3244_p9, %p3238_p10 }
  0xa4   : > { %495 = vmatpush1.bf16.msra.mxu0 %v2903_v13  ;;  %v307_v4 = vld [vmem:[%s3582_s13 + $0xe8] sm:$0xff]  ;;  %v323_v5 = vpack.c.bf16 %v305_v2, %v304_v1  ;;  %v308_v7 = vld [vmem:[%s3582_s13 + $0xf0] sm:$0xff]  ;;  %v309_v8 = vld [vmem:[%s3582_s13 + $0xf8] sm:$0xff] }
  0xa5   : > { %496 = vmatprep.subr.bf16.mxu0 %v2904_v14  ;;  %v324_v6 = vpack.c.bf16 %v307_v4, %v306_v3  ;;  %v325_v9 = vpack.c.bf16 %v309_v8, %v308_v7 }
  0xa6   : > { %2698 = vmatpush3.bf16.msra.mxu1 %v2916_v23 }
  0xa7   : > { %2699 = vmatprep.subr.bf16.mxu1 %v2917_v27 }
  0xa8   : > { %497 = vmatpush1.bf16.msra.mxu0 %v2906_v15 }
  0xa9   : > { %498 = vmatprep.subr.bf16.mxu0 %v2907_v16 }
  0xaa   : > { %2700 = vmatpush3.bf16.msra.mxu1 %v2917_v27 }
  0xab   : > { %2701 = vmatprep.subr.bf16.mxu1 %v2918_v28 }
  0xac   : > { %499 = vmatpush1.bf16.msra.mxu0 %v2909_v17 }
  0xad   : > { %500 = vmatprep.subr.bf16.mxu0 %v2910_v18 }
  0xae   : > { %2702 = vmatpush3.bf16.msra.mxu1 %v2918_v28 }
  0xaf   : > { %2703 = vmatprep.subr.bf16.mxu1 %v2919_v32 }
  0xb0   : > { %501 = vmatpush1.bf16.msra.mxu0 %v2912_v21 }
  0xb2   : > { %2704 = vmatpush3.bf16.msra.mxu1 %v2919_v32 }
  0xb3   : > { %519 = vmatmul.mubr.bf16.vlgmr.msra.gmra.mrb[0].mxu0 %v310_v12  ;;  %2705 = vmatprep.subr.bf16.mxu1 %v2920_v33 }
  0xb4   : > { %528 = vmatprep.mubr.bf16.mxu0 %v3337_v0 }
  0xb6   : > { %2706 = vmatpush3.bf16.msra.mxu1 %v2920_v33 }
  0xb9   : > { %2708 = vmatmul.mubr.bf16.vlgmr.msra.gmra.mrb[0].mxu1 %v311_v26 }
  0xba   : > { %2711 = vmatprep.mubr.bf16.mxu1 %v312_v31 }
  0xbb   : > { %529 = vmatmul.mubr.bf16.gmra.mrb[4].mxu0 %v311_v26 }
  0xbc   : > { %538 = vmatprep.mubr.bf16.mxu0 %v3337_v0 }
  0xc1   : > { %2712 = vmatmul.mubr.bf16.gmra.mrb[4].mxu1 %v313_v36 }
  0xc2   : > { %2715 = vmatprep.mubr.bf16.mxu1 %v314_v39 }
  0xc3   : > { %539 = vmatmul.mubr.bf16.gmra.mrb[8].mxu0 %v312_v31 }
  0xc4   : > { %548 = vmatprep.mubr.bf16.mxu0 %v3337_v0 }
  0xc9   : > { %2716 = vmatmul.mubr.bf16.gmra.mrb[8].mxu1 %v315_v42 }
  0xca   : > { %2719 = vmatprep.mubr.bf16.mxu1 %v316_v45 }
  0xcb   : > { %549 = vmatmul.mubr.bf16.gmra.mrb[12].mxu0 %v313_v36 }
  0xcc   : > { %558 = vmatprep.mubr.bf16.mxu0 %v3337_v0 }
  0xd1   : > { %2720 = vmatmul.mubr.bf16.gmra.mrb[12].mxu1 %v317_v50 }
  0xd2   : > { %2723 = vmatprep.mubr.bf16.mxu1 %v318_v51 }
  0xd3   : > { %559 = vmatmul.mubr.bf16.gmra.mrb[16].mxu0 %v314_v39 }
  0xd4   : > { %568 = vmatprep.mubr.bf16.mxu0 %v3337_v0 }
  0xd9   : > { %2724 = vmatmul.mubr.bf16.gmra.mrb[16].mxu1 %v319_v56 }
  0xda   : > { %2727 = vmatprep.mubr.bf16.mxu1 %v320_v57 }
  0xdb   : > { %569 = vmatmul.mubr.bf16.gmra.mrb[20].mxu0 %v315_v42 }
  0xdc   : > { %578 = vmatprep.mubr.bf16.mxu0 %v3337_v0 }
  0xe1   : > { %2728 = vmatmul.mubr.bf16.gmra.mrb[20].mxu1 %v321_v62 }
  0xe2   : > { %2731 = vmatprep.mubr.bf16.mxu1 %v322_v63 }
  0xe3   : > { %579 = vmatmul.mubr.bf16.gmra.mrb[24].mxu0 %v316_v45 }
  0xe4   : > { %588 = vmatprep.mubr.bf16.mxu0 %v3337_v0 }
  0xe9   : > { %2732 = vmatmul.mubr.bf16.gmra.mrb[24].mxu1 %v323_v5 }
  0xea   : > { %2735 = vmatprep.mubr.bf16.mxu1 %v324_v6 }
  0xeb   : > { %589 = vmatmul.mubr.bf16.gmra.mrb[28].mxu0 %v317_v50 }
  0xec   : > { %598 = vmatprep.mubr.bf16.mxu0 %v3337_v0 }
  0xf1   : > { %2736 = vmatmul.mubr.bf16.gmra.mrb[28].mxu1 %v325_v9 }
  0xf3   : > { %599 = vmatmul.mubr.bf16.gmra.mrb[32].mxu0 %v318_v51 }
  0xf4   : > { %608 = vmatprep.mubr.bf16.mxu0 %v3337_v0 }
  0xfb   : > { %609 = vmatmul.mubr.bf16.gmra.mrb[36].mxu0 %v319_v56 }
  0xfc   : > { %618 = vmatprep.mubr.bf16.mxu0 %v3337_v0 }
 0x103   : > { %619 = vmatmul.mubr.bf16.gmra.mrb[40].mxu0 %v320_v57 }
 0x104   : > { %628 = vmatprep.mubr.bf16.mxu0 %v3337_v0 }
 0x10b   : > { %629 = vmatmul.mubr.bf16.gmra.mrb[44].mxu0 %v321_v62 }
 0x10c   : > { %638 = vmatprep.mubr.bf16.mxu0 %v3337_v0 }
 0x113   : > { %639 = vmatmul.mubr.bf16.gmra.mrb[48].mxu0 %v322_v63 }
 0x114   : > { %648 = vmatprep.mubr.bf16.mxu0 %v3337_v0 }
 0x11b   : > { %649 = vmatmul.mubr.bf16.gmra.mrb[52].mxu0 %v323_v5 }
 0x11c   : > { %658 = vmatprep.mubr.bf16.mxu0 %v3337_v0 }
 0x123   : > { %659 = vmatmul.mubr.bf16.gmra.mrb[56].mxu0 %v324_v6 }
 0x124   : > { %668 = vmatprep.mubr.bf16.mxu0 %v3337_v0 }
 0x12b   : > { %669 = vmatmul.mubr.bf16.gmra.mrb[60].mxu0 %v325_v9 }
 0x186   : > { %v520_v10 = vpop.f32.mrb[0].mxu0 }
 0x187   : > { %v3644_v11 = vpop.f32.mrb[1].mxu0  ;;  %v974_v13 = vmul.f32 0.088388346, %v520_v10 }
 0x188   : > { %v524_v12 = vpop.f32.mrb[2].mxu0 }
 0x189   : > { %v975_v14 = vmul.f32 0.088388346, %v524_v12  ;;  %v3646_v15 = vpop.f32.mrb[3].mxu0 }
 0x18a   : > { %v1054_v16 = vpack.c.bf16 %v3646_v15, %v3644_v11 }
 0x18b   : > { %v3650_v17 = vpack.c.bf16 %v975_v14, %v974_v13 }
 0x18d   : > { %2523 = vmatprep.mubr.bf16.mxu1 %v3650_v17 }
 0x18e   : > { %v530_v18 = vpop.f32.mrb[4].mxu0 }
 0x18f   : > { %v3653_v19 = vpop.f32.mrb[5].mxu0  ;;  %v976_v20 = vmul.f32 0.088388346, %v530_v18 }
 0x190   : > { %v534_v0 = vpop.f32.mrb[6].mxu0 }
 0x191   : > { %v977_v21 = vmul.f32 0.088388346, %v534_v0  ;;  %v3655_v22 = vpop.f32.mrb[7].mxu0 }
 0x192   : > { %v1055_v23 = vpack.c.bf16 %v3655_v22, %v3653_v19 }
 0x193   : > { %v3659_v24 = vpack.c.bf16 %v977_v21, %v976_v20 }
 0x196   : > { %v540_v25 = vpop.f32.mrb[8].mxu0 }
 0x197   : > { %v3661_v26 = vpop.f32.mrb[9].mxu0  ;;  %v978_v28 = vmul.f32 0.088388346, %v540_v25 }
 0x198   : > { %v544_v27 = vpop.f32.mrb[10].mxu0 }
 0x199   : > { %v979_v29 = vmul.f32 0.088388346, %v544_v27  ;;  %v3663_v30 = vpop.f32.mrb[11].mxu0 }
 0x19a   : > { %v1056_v31 = vpack.c.bf16 %v3663_v30, %v3661_v26 }
 0x19b   : > { %v3667_v32 = vpack.c.bf16 %v979_v29, %v978_v28 }
 0x19e   : > { %v550_v33 = vpop.f32.mrb[12].mxu0 }
 0x19f   : > { %v3669_v34 = vpop.f32.mrb[13].mxu0  ;;  %v980_v36 = vmul.f32 0.088388346, %v550_v33 }
 0x1a0   : > { %v554_v35 = vpop.f32.mrb[14].mxu0 }
 0x1a1   : > { %v981_v37 = vmul.f32 0.088388346, %v554_v35  ;;  %v3671_v38 = vpop.f32.mrb[15].mxu0 }
 0x1a2   : > { %v1057_v39 = vpack.c.bf16 %v3671_v38, %v3669_v34 }
 0x1a3   : > { %v3675_v40 = vpack.c.bf16 %v981_v37, %v980_v36 }
 0x1a6   : > { %v560_v41 = vpop.f32.mrb[16].mxu0 }
 0x1a7   : > { %v3677_v42 = vpop.f32.mrb[17].mxu0  ;;  %v982_v44 = vmul.f32 0.088388346, %v560_v41 }
 0x1a8   : > { %v564_v43 = vpop.f32.mrb[18].mxu0 }
 0x1a9   : > { %v983_v45 = vmul.f32 0.088388346, %v564_v43  ;;  %v3679_v46 = vpop.f32.mrb[19].mxu0 }
 0x1aa   : > { %v1058_v47 = vpack.c.bf16 %v3679_v46, %v3677_v42 }
 0x1ab   : > { %v3683_v48 = vpack.c.bf16 %v983_v45, %v982_v44 }
 0x1ae   : > { %v570_v49 = vpop.f32.mrb[20].mxu0 }
 0x1af   : > { %v3685_v50 = vpop.f32.mrb[21].mxu0  ;;  %v984_v52 = vmul.f32 0.088388346, %v570_v49 }
 0x1b0   : > { %v574_v51 = vpop.f32.mrb[22].mxu0 }
 0x1b1   : > { %v985_v53 = vmul.f32 0.088388346, %v574_v51  ;;  %v3687_v54 = vpop.f32.mrb[23].mxu0 }
 0x1b2   : > { %v1059_v55 = vpack.c.bf16 %v3687_v54, %v3685_v50 }
 0x1b3   : > { %v3691_v56 = vpack.c.bf16 %v985_v53, %v984_v52 }
 0x1b6   : > { %v580_v57 = vpop.f32.mrb[24].mxu0 }
 0x1b7   : > { %v3693_v58 = vpop.f32.mrb[25].mxu0  ;;  %v986_v60 = vmul.f32 0.088388346, %v580_v57 }
 0x1b8   : > { %v584_v59 = vpop.f32.mrb[26].mxu0 }
 0x1b9   : > { %v987_v61 = vmul.f32 0.088388346, %v584_v59  ;;  %v3695_v62 = vpop.f32.mrb[27].mxu0 }
 0x1ba   : > { %v1060_v63 = vpack.c.bf16 %v3695_v62, %v3693_v58 }
 0x1bb   : > { %v3699_v1 = vpack.c.bf16 %v987_v61, %v986_v60 }
 0x1be   : > { %v590_v2 = vpop.f32.mrb[28].mxu0 }
 0x1bf   : > { %v3701_v3 = vpop.f32.mrb[29].mxu0  ;;  %v988_v5 = vmul.f32 0.088388346, %v590_v2 }
 0x1c0   : > { %v594_v4 = vpop.f32.mrb[30].mxu0 }
 0x1c1   : > { %v989_v6 = vmul.f32 0.088388346, %v594_v4  ;;  %v3703_v7 = vpop.f32.mrb[31].mxu0 }
 0x1c2   : > { %v1061_v8 = vpack.c.bf16 %v3703_v7, %v3701_v3 }
 0x1c3   : > { %v3707_v9 = vpack.c.bf16 %v989_v6, %v988_v5 }
 0x1c6   : > { %v600_v10 = vpop.f32.mrb[32].mxu0 }
 0x1c7   : > { %v602_v12 = vpop.f32.mrb[33].mxu0  ;;  %v990_v14 = vmul.f32 0.088388346, %v600_v10 }
 0x1c8   : > { %v604_v13 = vpop.f32.mrb[34].mxu0 }
 0x1c9   : > { %v991_v18 = vmul.f32 0.088388346, %v604_v13  ;;  %v606_v0 = vpop.f32.mrb[35].mxu0 }
 0x1ca   : > { %v1062_v20 = vpack.c.bf16 %v606_v0, %v602_v12 }
 0x1cb   : > { %v3709_v21 = vpack.c.bf16 %v991_v18, %v990_v14 }
 0x1cc   : > { %2507 = vmatprep.subr.bf16.mxu1 %v1062_v20 }
 0x1cd   : > { %2508 = vmatpush3.bf16.xpose.msra.mxu1 %v1054_v16 }
 0x1ce   : > { %v610_v25 = vpop.f32.mrb[36].mxu0 }
 0x1cf   : > { %v612_v27 = vpop.f32.mrb[37].mxu0  ;;  %v992_v29 = vmul.f32 0.088388346, %v610_v25 }
 0x1d0   : > { %v614_v28 = vpop.f32.mrb[38].mxu0 }
 0x1d1   : > { %v993_v33 = vmul.f32 0.088388346, %v614_v28  ;;  %v616_v35 = vpop.f32.mrb[39].mxu0 }
 0x1d2   : > { %v1063_v36 = vpack.c.bf16 %v616_v35, %v612_v27 }
 0x1d3   : > { %v3714_v37 = vpack.c.bf16 %v993_v33, %v992_v29 }
 0x1d4   : > { %2509 = vmatprep.subr.bf16.mxu1 %v1063_v36 }
 0x1d5   : > { %2510 = vmatpush3.bf16.xpose.msra.mxu1 %v1055_v23 }
 0x1d6   : > { %v620_v41 = vpop.f32.mrb[40].mxu0 }
 0x1d7   : > { %v622_v43 = vpop.f32.mrb[41].mxu0  ;;  %v994_v45 = vmul.f32 0.088388346, %v620_v41  ;;  %v3746_v41 = vpop.f32.mrb[0].mxu1 }
 0x1d8   : > { %v624_v44 = vpop.f32.mrb[42].mxu0  ;;  %4360 = vst [vmem:[#allocation16_spill] sm:$0xff] %v3746_v41 }
 0x1d9   : > { %v995_v11 = vmul.f32 0.088388346, %v624_v44  ;;  %v626_v15 = vpop.f32.mrb[43].mxu0 }
 0x1da   : > { %v1064_v16 = vpack.c.bf16 %v626_v15, %v622_v43  ;;  %v3751_v43 = vpop.f32.mrb[1].mxu1 }
 0x1db   : > { %v3719_v49 = vpack.c.bf16 %v995_v11, %v994_v45  ;;  %4361 = vst [vmem:[#allocation17_spill] sm:$0xff] %v3751_v43  ;;  %v3753_v58 = vpop.f32.mrb[2].mxu1 }
 0x1dc   : > { %2511 = vmatprep.subr.bf16.mxu1 %v1064_v16  ;;  %4362 = vst [vmem:[#allocation18_spill] sm:$0xff] %v3753_v58  ;;  %v1712_v62 = vpack.c.bf16 %v3753_v58, %v3746_v41 }
 0x1dd   : > { %2512 = vmatpush3.bf16.xpose.msra.mxu1 %v1056_v31 }
 0x1de   : > { %v630_v51 = vpop.f32.mrb[44].mxu0 }
 0x1df   : > { %v632_v52 = vpop.f32.mrb[45].mxu0  ;;  %v996_v57 = vmul.f32 0.088388346, %v630_v51 }
 0x1e0   : > { %v634_v53 = vpop.f32.mrb[46].mxu0 }
 0x1e1   : > { %v997_v19 = vmul.f32 0.088388346, %v634_v53  ;;  %v636_v22 = vpop.f32.mrb[47].mxu0 }
 0x1e2   : > { %v1065_v23 = vpack.c.bf16 %v636_v22, %v632_v52 }
 0x1e3   : > { %v3724_v59 = vpack.c.bf16 %v997_v19, %v996_v57 }
 0x1e4   : > { %2513 = vmatprep.subr.bf16.mxu1 %v1065_v23 }
 0x1e5   : > { %2514 = vmatpush3.bf16.xpose.msra.mxu1 %v1057_v39 }
 0x1e6   : > { %v640_v60 = vpop.f32.mrb[48].mxu0 }
 0x1e7   : > { %v642_v61 = vpop.f32.mrb[49].mxu0  ;;  %v998_v4 = vmul.f32 0.088388346, %v640_v60 }
 0x1e8   : > { %v644_v2 = vpop.f32.mrb[50].mxu0 }
 0x1e9   : > { %v999_v26 = vmul.f32 0.088388346, %v644_v2  ;;  %v646_v30 = vpop.f32.mrb[51].mxu0 }
 0x1ea   : > { %v1066_v31 = vpack.c.bf16 %v646_v30, %v642_v61 }
 0x1eb   : > { %v3729_v5 = vpack.c.bf16 %v999_v26, %v998_v4 }
 0x1ec   : > { %2515 = vmatprep.subr.bf16.mxu1 %v1066_v31 }
 0x1ed   : > { %2516 = vmatpush3.bf16.xpose.msra.mxu1 %v1058_v47 }
 0x1ee   : > { %v650_v6 = vpop.f32.mrb[52].mxu0 }
 0x1ef   : > { %v652_v10 = vpop.f32.mrb[53].mxu0  ;;  %v1000_v13 = vmul.f32 0.088388346, %v650_v6 }
 0x1f0   : > { %v654_v12 = vpop.f32.mrb[54].mxu0 }
 0x1f1   : > { %v1001_v34 = vmul.f32 0.088388346, %v654_v12  ;;  %v656_v38 = vpop.f32.mrb[55].mxu0 }
 0x1f2   : > { %v1067_v39 = vpack.c.bf16 %v656_v38, %v652_v10 }
 0x1f3   : > { %v3734_v14 = vpack.c.bf16 %v1001_v34, %v1000_v13 }
 0x1f4   : > { %2517 = vmatprep.subr.bf16.mxu1 %v1067_v39 }
 0x1f5   : > { %2518 = vmatpush3.bf16.xpose.msra.mxu1 %v1059_v55 }
 0x1f6   : > { %v660_v18 = vpop.f32.mrb[56].mxu0 }
 0x1f7   : > { %v662_v0 = vpop.f32.mrb[57].mxu0  ;;  %v1002_v25 = vmul.f32 0.088388346, %v660_v18 }
 0x1f8   : > { %v664_v20 = vpop.f32.mrb[58].mxu0 }
 0x1f9   : > { %v1003_v42 = vmul.f32 0.088388346, %v664_v20  ;;  %v666_v46 = vpop.f32.mrb[59].mxu0 }
 0x1fa   : > { %v1068_v47 = vpack.c.bf16 %v666_v46, %v662_v0 }
 0x1fb   : > { %v3739_v27 = vpack.c.bf16 %v1003_v42, %v1002_v25 }
 0x1fc   : > { %2519 = vmatprep.subr.bf16.mxu1 %v1068_v47 }
 0x1fd   : > { %2520 = vmatpush3.bf16.xpose.msra.mxu1 %v1060_v63  ;;  %v3757_v63 = vpop.f32.mrb[3].mxu1 }
 0x1fe   : > { %v670_v28 = vpop.f32.mrb[60].mxu0  ;;  %4363 = vst [vmem:[#allocation19_spill] sm:$0xff] %v3757_v63  ;;  %v1711_v44 = vpack.c.bf16 %v3757_v63, %v3751_v43  ;;  %v3761_v45 = vpop.f32.mrb[4].mxu1 }
 0x1ff   : > { %v672_v29 = vpop.f32.mrb[61].mxu0  ;;  %v1004_v35 = vmul.f32 0.088388346, %v670_v28  ;;  %4364 = vst [vmem:[#allocation20_spill] sm:$0xff] %v3761_v45  ;;  %v3763_v11 = vpop.f32.mrb[5].mxu1 }
 0x200   : > { %v674_v33 = vpop.f32.mrb[62].mxu0  ;;  %4365 = vst [vmem:[#allocation21_spill] sm:$0xff] %v3763_v11  ;;  %v3765_v15 = vpop.f32.mrb[6].mxu1 }
 0x201   : > { %v1005_v50 = vmul.f32 0.088388346, %v674_v33  ;;  %v676_v54 = vpop.f32.mrb[63].mxu0  ;;  %4366 = vst [vmem:[#allocation22_spill] sm:$0xff] %v3765_v15  ;;  %v1714_v3 = vpack.c.bf16 %v3765_v15, %v3761_v45  ;;  %v3769_v7 = vpop.f32.mrb[7].mxu1 }
 0x202   : > { %v1069_v55 = vpack.c.bf16 %v676_v54, %v672_v29  ;;  %4367 = vst [vmem:[#allocation23_spill] sm:$0xff] %v3769_v7  ;;  %v3774_v16 = vpop.f32.mrb[8].mxu1 }
 0x203   : > { %v3744_v36 = vpack.c.bf16 %v1005_v50, %v1004_v35  ;;  %4368 = vst [vmem:[#allocation24_spill] sm:$0xff] %v3774_v16  ;;  %v3777_v51 = vpop.f32.mrb[9].mxu1 }
 0x204   : > { %2521 = vmatprep.subr.bf16.mxu1 %v1069_v55  ;;  %4369 = vst [vmem:[#allocation25_spill] sm:$0xff] %v3777_v51  ;;  %v3779_v52 = vpop.f32.mrb[10].mxu1 }
 0x205   : > { %2522 = vmatpush3.bf16.xpose.msra.mxu1 %v1061_v8  ;;  %v1713_v8 = vpack.c.bf16 %v3769_v7, %v3763_v11  ;;  %4370 = vst [vmem:[#allocation26_spill] sm:$0xff] %v3779_v52  ;;  %v1716_v53 = vpack.c.bf16 %v3779_v52, %v3774_v16  ;;  %v3783_v57 = vpop.f32.mrb[11].mxu1 }
 0x206   : > { %4371 = vst [vmem:[#allocation27_spill] sm:$0xff] %v3783_v57  ;;  %v1715_v19 = vpack.c.bf16 %v3783_v57, %v3777_v51 }
 0x20c   : > { %2524 = vmatmul.mubr.bf16.vlgmr.msra.gmra.mrb[32].mxu1 %v3650_v17  ;;  %v3787_v17 = vpop.f32.mrb[12].mxu1 }
 0x20d   : > { %2525 = vmatprep.mubr.bf16.mxu1 %v3659_v24  ;;  %4372 = vst [vmem:[#allocation28_spill] sm:$0xff] %v3787_v17  ;;  %v3789_v22 = vpop.f32.mrb[13].mxu1 }
 0x20e   : > { %4373 = vst [vmem:[#allocation29_spill] sm:$0xff] %v3789_v22  ;;  %v3791_v23 = vpop.f32.mrb[14].mxu1 }
 0x20f   : > { %4374 = vst [vmem:[#allocation30_spill] sm:$0xff] %v3791_v23  ;;  %v1718_v60 = vpack.c.bf16 %v3791_v23, %v3787_v17  ;;  %v3795_v61 = vpop.f32.mrb[15].mxu1 }
 0x210   : > { %4375 = vst [vmem:[#allocation31_spill] sm:$0xff] %v3795_v61  ;;  %v1717_v2 = vpack.c.bf16 %v3795_v61, %v3789_v22  ;;  %v3800_v4 = vpop.f32.mrb[16].mxu1 }
 0x211   : > { %4376 = vst [vmem:[#allocation32_spill] sm:$0xff] %v3800_v4  ;;  %v3803_v26 = vpop.f32.mrb[17].mxu1 }
 0x212   : > { %4377 = vst [vmem:[#allocation33_spill] sm:$0xff] %v3803_v26  ;;  %v3805_v30 = vpop.f32.mrb[18].mxu1 }
 0x213   : > { %4378 = vst [vmem:[#allocation34_spill] sm:$0xff] %v3805_v30  ;;  %v1720_v31 = vpack.c.bf16 %v3805_v30, %v3800_v4  ;;  %v3809_v6 = vpop.f32.mrb[19].mxu1 }
 0x214   : > { %2526 = vmatmul.mubr.bf16.gmra.mrb[36].mxu1 %v3659_v24  ;;  %4379 = vst [vmem:[#allocation35_spill] sm:$0xff] %v3809_v6  ;;  %v1719_v10 = vpack.c.bf16 %v3809_v6, %v3803_v26  ;;  %v3813_v24 = vpop.f32.mrb[20].mxu1 }
 0x215   : > { %2527 = vmatprep.mubr.bf16.mxu1 %v3667_v32  ;;  %4380 = vst [vmem:[#allocation36_spill] sm:$0xff] %v3813_v24  ;;  %v3815_v12 = vpop.f32.mrb[21].mxu1 }
 0x216   : > { %4381 = vst [vmem:[#allocation37_spill] sm:$0xff] %v3815_v12  ;;  %2555 = vmatprep.subr.bf16.mxu0 %v1719_v10  ;;  %v3817_v13 = vpop.f32.mrb[22].mxu1 }
 0x217   : > { %4382 = vst [vmem:[#allocation38_spill] sm:$0xff] %v3817_v13  ;;  %2556 = vmatpush3.bf16.msra.mxu0 %v1711_v44  ;;  %v1722_v34 = vpack.c.bf16 %v3817_v13, %v3813_v24  ;;  %v3821_v38 = vpop.f32.mrb[23].mxu1 }
 0x218   : > { %4383 = vst [vmem:[#allocation39_spill] sm:$0xff] %v3821_v38  ;;  %2557 = vmatprep.subr.bf16.mxu0 %v1720_v31  ;;  %v1721_v39 = vpack.c.bf16 %v3821_v38, %v3815_v12  ;;  %v3826_v18 = vpop.f32.mrb[24].mxu1 }
 0x219   : > { %4384 = vst [vmem:[#allocation40_spill] sm:$0xff] %v3826_v18  ;;  %v3829_v0 = vpop.f32.mrb[25].mxu1 }
 0x21a   : > { %4385 = vst [vmem:[#allocation41_spill] sm:$0xff] %v3829_v0  ;;  %v3831_v20 = vpop.f32.mrb[26].mxu1 }
 0x21b   : > { %4386 = vst [vmem:[#allocation42_spill] sm:$0xff] %v3831_v20  ;;  %2558 = vmatpush3.bf16.msra.mxu0 %v1712_v62  ;;  %v1724_v25 = vpack.c.bf16 %v3831_v20, %v3826_v18  ;;  %v3835_v42 = vpop.f32.mrb[27].mxu1 }
 0x21c   : > { %2528 = vmatmul.mubr.bf16.gmra.mrb[40].mxu1 %v3667_v32  ;;  %4387 = vst [vmem:[#allocation43_spill] sm:$0xff] %v3835_v42  ;;  %2559 = vmatprep.subr.bf16.mxu0 %v1721_v39  ;;  %v1723_v32 = vpack.c.bf16 %v3835_v42, %v3829_v0  ;;  %v3839_v46 = vpop.f32.mrb[28].mxu1 }
 0x21d   : > { %2529 = vmatprep.mubr.bf16.mxu1 %v3675_v40  ;;  %4388 = vst [vmem:[#allocation44_spill] sm:$0xff] %v3839_v46  ;;  %v3841_v47 = vpop.f32.mrb[29].mxu1 }
 0x21e   : > { %4389 = vst [vmem:[#allocation45_spill] sm:$0xff] %v3841_v47  ;;  %v3843_v28 = vpop.f32.mrb[30].mxu1 }
 0x21f   : > { %4390 = vst [vmem:[#allocation46_spill] sm:$0xff] %v3843_v28  ;;  %2560 = vmatpush3.bf16.msra.mxu0 %v1713_v8  ;;  %v1726_v29 = vpack.c.bf16 %v3843_v28, %v3839_v46  ;;  %v3847_v33 = vpop.f32.mrb[31].mxu1 }
 0x220   : > { %4391 = vst [vmem:[#allocation47_spill] sm:$0xff] %v3847_v33  ;;  %2561 = vmatprep.subr.bf16.mxu0 %v1722_v34  ;;  %v1725_v35 = vpack.c.bf16 %v3847_v33, %v3841_v47 }
 0x223   : > { %2562 = vmatpush3.bf16.msra.mxu0 %v1714_v3 }
 0x224   : > { %2530 = vmatmul.mubr.bf16.gmra.mrb[44].mxu1 %v3675_v40  ;;  %2563 = vmatprep.subr.bf16.mxu0 %v1723_v32 }
 0x225   : > { %2531 = vmatprep.mubr.bf16.mxu1 %v3683_v48 }
 0x227   : > { %2564 = vmatpush3.bf16.msra.mxu0 %v1715_v19 }
 0x228   : > { %2565 = vmatprep.subr.bf16.mxu0 %v1724_v25 }
 0x22b   : > { %2566 = vmatpush3.bf16.msra.mxu0 %v1716_v53 }
 0x22c   : > { %2532 = vmatmul.mubr.bf16.gmra.mrb[48].mxu1 %v3683_v48  ;;  %2567 = vmatprep.subr.bf16.mxu0 %v1725_v35 }
 0x22d   : > { %2533 = vmatprep.mubr.bf16.mxu1 %v3691_v56 }
 0x22f   : > { %2568 = vmatpush3.bf16.msra.mxu0 %v1717_v2 }
 0x230   : > { %2569 = vmatprep.subr.bf16.mxu0 %v1726_v29 }
 0x233   : > { %2570 = vmatpush3.bf16.msra.mxu0 %v1718_v60 }
 0x234   : > { %2534 = vmatmul.mubr.bf16.gmra.mrb[52].mxu1 %v3691_v56 }
 0x235   : > { %2535 = vmatprep.mubr.bf16.mxu1 %v3699_v1 }
 0x23c   : > { %2536 = vmatmul.mubr.bf16.gmra.mrb[56].mxu1 %v3699_v1 }
 0x23d   : > { %2537 = vmatprep.mubr.bf16.mxu1 %v3707_v9 }
 0x244   : > { %2538 = vmatmul.mubr.bf16.gmra.mrb[60].mxu1 %v3707_v9 }
 0x245   : > { %2539 = vmatprep.mubr.bf16.mxu1 %v3709_v21 }
 0x24c   : > { %2540 = vmatmul.mubr.bf16.gmra.mrb[64].mxu1 %v3709_v21 }
 0x24d   : > { %2541 = vmatprep.mubr.bf16.mxu1 %v3714_v37 }
 0x254   : > { %2542 = vmatmul.mubr.bf16.gmra.mrb[68].mxu1 %v3714_v37 }
 0x255   : > { %2543 = vmatprep.mubr.bf16.mxu1 %v3719_v49 }
 0x25c   : > { %2544 = vmatmul.mubr.bf16.gmra.mrb[72].mxu1 %v3719_v49 }
 0x25d   : > { %2545 = vmatprep.mubr.bf16.mxu1 %v3724_v59 }
 0x264   : > { %2546 = vmatmul.mubr.bf16.gmra.mrb[76].mxu1 %v3724_v59 }
 0x265   : > { %2547 = vmatprep.mubr.bf16.mxu1 %v3729_v5 }
 0x26c   : > { %2548 = vmatmul.mubr.bf16.gmra.mrb[80].mxu1 %v3729_v5 }
 0x26d   : > { %2549 = vmatprep.mubr.bf16.mxu1 %v3734_v14 }
 0x274   : > { %2550 = vmatmul.mubr.bf16.gmra.mrb[84].mxu1 %v3734_v14 }
 0x275   : > { %2551 = vmatprep.mubr.bf16.mxu1 %v3739_v27 }
 0x27c   : > { %2552 = vmatmul.mubr.bf16.gmra.mrb[88].mxu1 %v3739_v27 }
 0x27d   : > { %2553 = vmatprep.mubr.bf16.mxu1 %v3744_v36 }
 0x284   : > { %2554 = vmatmul.mubr.bf16.gmra.mrb[92].mxu1 %v3744_v36 }
 0x2df   : > { %v3876_v40 = vpop.f32.mrb[32].mxu1 }
 0x2e0   : > { %v3878_v48 = vpop.f32.mrb[33].mxu1 }
 0x2e1   : > { %v3880_v56 = vpop.f32.mrb[34].mxu1  ;;  %v1295_v1 = vmax.f32 %v3876_v40, %v3878_v48 }
 0x2e2   : > { %v3884_v9 = vpop.f32.mrb[35].mxu1 }
 0x2e3   : > { %1296 = vmax.xlane.f32.xlu0 %v1295_v1  ;;  %v1298_v21 = vmax.f32 %v3880_v56, %v3884_v9 }
 0x2e7   : > { %1299 = vmax.xlane.f32.xlu0 %v1298_v21  ;;  %v3888_v37 = vpop.f32.mrb[36].mxu1 }
 0x2e8   : > { %v3890_v49 = vpop.f32.mrb[37].mxu1 }
 0x2e9   : > { %v3892_v59 = vpop.f32.mrb[38].mxu1  ;;  %v1301_v5 = vmax.f32 %v3888_v37, %v3890_v49 }
 0x2ea   : > { %v3896_v14 = vpop.f32.mrb[39].mxu1 }
 0x2eb   : > { %1302 = vmax.xlane.f32.xlu1 %v1301_v5  ;;  %v1304_v27 = vmax.f32 %v3892_v59, %v3896_v14 }
 0x2ef   : > { %1305 = vmax.xlane.f32.xlu1 %v1304_v27  ;;  %v3900_v50 = vpop.f32.mrb[40].mxu1 }
 0x2f0   : > { %v3902_v54 = vpop.f32.mrb[41].mxu1 }
 0x2f1   : > { %v3904_v55 = vpop.f32.mrb[42].mxu1  ;;  %v1307_v36 = vmax.f32 %v3900_v50, %v3902_v54 }
 0x2f2   : > { %v3908_v62 = vpop.f32.mrb[43].mxu1 }
 0x2f3   : > { %1308 = vmax.xlane.f32.xlu0 %v1307_v36  ;;  %v1310_v44 = vmax.f32 %v3904_v55, %v3908_v62 }
 0x2f5   : > { %1311 = vmax.xlane.f32.xlu1 %v1310_v44 }
 0x2f7   : > { %v3912_v3 = vpop.f32.mrb[44].mxu1 }
 0x2f8   : > { %v3914_v8 = vpop.f32.mrb[45].mxu1 }
 0x2f9   : > { %v3916_v53 = vpop.f32.mrb[46].mxu1  ;;  %v1313_v19 = vmax.f32 %v3912_v3, %v3914_v8 }
 0x2fa   : > { %v3920_v60 = vpop.f32.mrb[47].mxu1 }
 0x2fb   : > { %1314 = vmax.xlane.f32.xlu0 %v1313_v19  ;;  %v1316_v2 = vmax.f32 %v3916_v53, %v3920_v60 }
 0x2fd   : > { %1317 = vmax.xlane.f32.xlu1 %v1316_v2 }
 0x2ff   : > { %v3924_v31 = vpop.f32.mrb[48].mxu1 }
 0x300   : > { %v3926_v10 = vpop.f32.mrb[49].mxu1 }
 0x301   : > { %v3928_v34 = vpop.f32.mrb[50].mxu1  ;;  %v1319_v39 = vmax.f32 %v3924_v31, %v3926_v10 }
 0x302   : > { %v3932_v25 = vpop.f32.mrb[51].mxu1 }
 0x303   : > { %1320 = vmax.xlane.f32.xlu0 %v1319_v39  ;;  %v1322_v32 = vmax.f32 %v3928_v34, %v3932_v25 }
 0x305   : > { %1323 = vmax.xlane.f32.xlu1 %v1322_v32 }
 0x307   : > { %v3936_v29 = vpop.f32.mrb[52].mxu1 }
 0x308   : > { %v3938_v35 = vpop.f32.mrb[53].mxu1 }
 0x309   : > { %v3940_v1 = vpop.f32.mrb[54].mxu1  ;;  %v1325_v21 = vmax.f32 %v3936_v29, %v3938_v35 }
 0x30a   : > { %v3944_v5 = vpop.f32.mrb[55].mxu1 }
 0x30b   : > { %1326 = vmax.xlane.f32.xlu0 %v1325_v21  ;;  %v1328_v27 = vmax.f32 %v3940_v1, %v3944_v5 }
 0x30d   : > { %1329 = vmax.xlane.f32.xlu1 %v1328_v27 }
 0x30f   : > { %v3948_v36 = vpop.f32.mrb[56].mxu1 }
 0x310   : > { %v3950_v44 = vpop.f32.mrb[57].mxu1 }
 0x311   : > { %v3952_v19 = vpop.f32.mrb[58].mxu1  ;;  %v1331_v2 = vmax.f32 %v3948_v36, %v3950_v44 }
 0x312   : > { %v3956_v39 = vpop.f32.mrb[59].mxu1 }
 0x313   : > { %1332 = vmax.xlane.f32.xlu0 %v1331_v2  ;;  %v1334_v32 = vmax.f32 %v3952_v19, %v3956_v39 }
 0x315   : > { %1335 = vmax.xlane.f32.xlu1 %v1334_v32 }
 0x317   : > { %v3960_v21 = vpop.f32.mrb[60].mxu1 }
 0x318   : > { %v3962_v33 = vpop.f32.mrb[61].mxu1 }
 0x319   : > { %v3964_v27 = vpop.f32.mrb[62].mxu1  ;;  %v1337_v28 = vmax.f32 %v3960_v21, %v3962_v33 }
 0x31a   : > { %v3968_v47 = vpop.f32.mrb[63].mxu1 }
 0x31b   : > { %1338 = vmax.xlane.f32.xlu0 %v1337_v28  ;;  %v1340_v46 = vmax.f32 %v3964_v27, %v3968_v47 }
 0x31d   : > { %1341 = vmax.xlane.f32.xlu1 %v1340_v46 }
 0x31f   : > { %v3972_v2 = vpop.f32.mrb[64].mxu1 }
 0x320   : > { %v3974_v42 = vpop.f32.mrb[65].mxu1 }
 0x321   : > { %v3976_v32 = vpop.f32.mrb[66].mxu1  ;;  %v1343_v20 = vmax.f32 %v3972_v2, %v3974_v42 }
 0x322   : > { %v3980_v0 = vpop.f32.mrb[67].mxu1 }
 0x323   : > { %1344 = vmax.xlane.f32.xlu0 %v1343_v20  ;;  %v1346_v18 = vmax.f32 %v3976_v32, %v3980_v0 }
 0x325   : > { %1347 = vmax.xlane.f32.xlu1 %v1346_v18 }
 0x327   : > { %v3984_v28 = vpop.f32.mrb[68].mxu1 }
 0x328   : > { %v3986_v38 = vpop.f32.mrb[69].mxu1 }
 0x329   : > { %v3988_v46 = vpop.f32.mrb[70].mxu1  ;;  %v1349_v13 = vmax.f32 %v3984_v28, %v3986_v38 }
 0x32a   : > { %v3992_v12 = vpop.f32.mrb[71].mxu1 }
 0x32b   : > { %1350 = vmax.xlane.f32.xlu0 %v1349_v13  ;;  %v1352_v24 = vmax.f32 %v3988_v46, %v3992_v12 }
 0x32d   : > { %1353 = vmax.xlane.f32.xlu1 %v1352_v24 }
 0x32f   : > { %v3996_v20 = vpop.f32.mrb[72].mxu1 }
 0x330   : > { %v3998_v6 = vpop.f32.mrb[73].mxu1 }
 0x331   : > { %v4000_v18 = vpop.f32.mrb[74].mxu1  ;;  %v1355_v30 = vmax.f32 %v3996_v20, %v3998_v6 }
 0x332   : > { %v4004_v26 = vpop.f32.mrb[75].mxu1 }
 0x333   : > { %1356 = vmax.xlane.f32.xlu0 %v1355_v30  ;;  %v1358_v4 = vmax.f32 %v4000_v18, %v4004_v26 }
 0x335   : > { %1359 = vmax.xlane.f32.xlu1 %v1358_v4 }
 0x337   : > { %v4008_v13 = vpop.f32.mrb[76].mxu1 }
 0x338   : > { %v4010_v61 = vpop.f32.mrb[77].mxu1 }
 0x339   : > { %v4012_v24 = vpop.f32.mrb[78].mxu1  ;;  %v1361_v23 = vmax.f32 %v4008_v13, %v4010_v61 }
 0x33a   : > { %v4016_v22 = vpop.f32.mrb[79].mxu1 }
 0x33b   : > { %1362 = vmax.xlane.f32.xlu0 %v1361_v23  ;;  %v1364_v17 = vmax.f32 %v4012_v24, %v4016_v22 }
 0x33d   : > { %1365 = vmax.xlane.f32.xlu1 %v1364_v17 }
 0x33f   : > { %v4020_v30 = vpop.f32.mrb[80].mxu1 }
 0x340   : > { %v4022_v57 = vpop.f32.mrb[81].mxu1 }
 0x341   : > { %v4024_v4 = vpop.f32.mrb[82].mxu1  ;;  %v1367_v52 = vmax.f32 %v4020_v30, %v4022_v57 }
 0x342   : > { %4392 = vst [vmem:[#allocation48_spill] sm:$0xff] %v4024_v4  ;;  %v4028_v51 = vpop.f32.mrb[83].mxu1 }
 0x343   : > { %4393 = vst [vmem:[#allocation49_spill] sm:$0xff] %v4028_v51  ;;  %1368 = vmax.xlane.f32.xlu0 %v1367_v52  ;;  %v1370_v16 = vmax.f32 %v4024_v4, %v4028_v51 }
 0x345   : > { %1371 = vmax.xlane.f32.xlu1 %v1370_v16 }
 0x347   : > { %v4032_v23 = vpop.f32.mrb[84].mxu1 }
 0x348   : > { %4394 = vst [vmem:[#allocation50_spill] sm:$0xff] %v4032_v23  ;;  %v4034_v7 = vpop.f32.mrb[85].mxu1 }
 0x349   : > { %4395 = vst [vmem:[#allocation51_spill] sm:$0xff] %v4034_v7  ;;  %v4036_v17 = vpop.f32.mrb[86].mxu1  ;;  %v1373_v15 = vmax.f32 %v4032_v23, %v4034_v7 }
 0x34a   : > { %4396 = vst [vmem:[#allocation52_spill] sm:$0xff] %v4036_v17  ;;  %v4040_v11 = vpop.f32.mrb[87].mxu1 }
 0x34b   : > { %4397 = vst [vmem:[#allocation53_spill] sm:$0xff] %v4040_v11  ;;  %1374 = vmax.xlane.f32.xlu0 %v1373_v15  ;;  %v1376_v45 = vmax.f32 %v4036_v17, %v4040_v11 }
 0x34d   : > { %1377 = vmax.xlane.f32.xlu1 %v1376_v45 }
 0x34f   : > { %v4044_v52 = vpop.f32.mrb[88].mxu1 }
 0x350   : > { %4398 = vst [vmem:[#allocation54_spill] sm:$0xff] %v4044_v52  ;;  %v4046_v63 = vpop.f32.mrb[89].mxu1 }
 0x351   : > { %4399 = vst [vmem:[#allocation55_spill] sm:$0xff] %v4046_v63  ;;  %v4048_v16 = vpop.f32.mrb[90].mxu1  ;;  %v1379_v58 = vmax.f32 %v4044_v52, %v4046_v63 }
 0x352   : > { %4400 = vst [vmem:[#allocation56_spill] sm:$0xff] %v4048_v16  ;;  %v4052_v43 = vpop.f32.mrb[91].mxu1 }
 0x353   : > { %4401 = vst [vmem:[#allocation57_spill] sm:$0xff] %v4052_v43  ;;  %1380 = vmax.xlane.f32.xlu0 %v1379_v58  ;;  %v1382_v41 = vmax.f32 %v4048_v16, %v4052_v43 }
 0x355   : > { %1383 = vmax.xlane.f32.xlu1 %v1382_v41 }
 0x357   : > { %v4056_v15 = vpop.f32.mrb[92].mxu1 }
 0x358   : > { %4402 = vst [vmem:[#allocation58_spill] sm:$0xff] %v4056_v15  ;;  %v4058_v11 = vpop.f32.mrb[93].mxu1 }
 0x359   : > { %4403 = vst [vmem:[#allocation59_spill] sm:$0xff] %v4058_v11  ;;  %v4060_v45 = vpop.f32.mrb[94].mxu1  ;;  %v1385_v17 = vmax.f32 %v4056_v15, %v4058_v11 }
 0x35a   : > { %v4064_v7 = vpop.f32.mrb[95].mxu1 }
 0x35b   : > { %4404 = vst [vmem:[#allocation60_spill] sm:$0xff] %v4064_v7  ;;  %1386 = vmax.xlane.f32.xlu0 %v1385_v17  ;;  %v1388_v63 = vmax.f32 %v4060_v45, %v4064_v7 }
 0x35d   : > { %1389 = vmax.xlane.f32.xlu1 %v1388_v63 }
 0x370   : > { %v1297_v58 = vpop.xlane.xlu0 %1296 }
 0x371   : > { %v1391_v43 = vsub.f32 %v3876_v40, %v1297_v58  ;;  %v1392_v41 = vsub.f32 %v3878_v48, %v1297_v58 }
 0x373   : > { %v1455_v16 = vmul.f32 1.442695, %v1391_v43  ;;  %v1457_v52 = vmul.f32 1.442695, %v1392_v41 }
 0x374   : > { %v1300_v23 = vpop.xlane.xlu0 %1299 }
 0x375   : > { %2929 = vpow2.f32 %v1455_v16  ;;  %v1393_v51 = vsub.f32 %v3880_v56, %v1300_v23  ;;  %v1394_v11 = vsub.f32 %v3884_v9, %v1300_v23 }
 0x376   : > { %2931 = vpow2.f32 %v1457_v52 }
 0x377   : > { %v1459_v15 = vmul.f32 1.442695, %v1393_v51  ;;  %v1461_v17 = vmul.f32 1.442695, %v1394_v11 }
 0x378   : > { %v1303_v4 = vpop.xlane.xlu1 %1302 }
 0x379   : > { %2933 = vpow2.f32 %v1459_v15  ;;  %v1395_v63 = vsub.f32 %v3888_v37, %v1303_v4  ;;  %v1396_v7 = vsub.f32 %v3890_v49, %v1303_v4 }
 0x37a   : > { %2935 = vpow2.f32 %v1461_v17 }
 0x37b   : > { %v1463_v40 = vmul.f32 1.442695, %v1395_v63  ;;  %v1465_v48 = vmul.f32 1.442695, %v1396_v7 }
 0x37c   : > { %v1306_v43 = vpop.xlane.xlu1 %1305 }
 0x37d   : > { %2937 = vpow2.f32 %v1463_v40  ;;  %v1397_v16 = vsub.f32 %v3892_v59, %v1306_v43  ;;  %v1398_v56 = vsub.f32 %v3896_v14, %v1306_v43 }
 0x37e   : > { %2939 = vpow2.f32 %v1465_v48 }
 0x37f   : > { %v2930_v9 = vpop.eup %2929  ;;  %v1467_v23 = vmul.f32 1.442695, %v1397_v16  ;;  %v1469_v51 = vmul.f32 1.442695, %v1398_v56 }
 0x380   : > { %v2932_v11 = vpop.eup %2931  ;;  %v1309_v52 = vpop.xlane.xlu0 %1308 }
 0x381   : > { %2941 = vpow2.f32 %v1467_v23  ;;  %v1399_v37 = vsub.f32 %v3900_v50, %v1309_v52  ;;  %v1400_v49 = vsub.f32 %v3902_v54, %v1309_v52  ;;  %v1583_v4 = vadd.f32 %v2932_v11, %v2930_v9 }
 0x382   : > { %2943 = vpow2.f32 %v1469_v51  ;;  %v1312_v7 = vpop.xlane.xlu1 %1311 }
 0x383   : > { %v2934_v15 = vpop.eup %2933  ;;  %v1471_v58 = vmul.f32 1.442695, %v1399_v37  ;;  %v1473_v41 = vmul.f32 1.442695, %v1400_v49  ;;  %v1401_v59 = vsub.f32 %v3904_v55, %v1312_v7  ;;  %v1402_v14 = vsub.f32 %v3908_v62, %v1312_v7  ;;  %1584 = vadd.xlane.f32.xlu0 %v1583_v4 }
 0x384   : > { %v2936_v17 = vpop.eup %2935  ;;  %v1679_v63 = vpack.c.bf16 %v2934_v15, %v2930_v9 }
 0x385   : > { %2945 = vpow2.f32 %v1471_v58  ;;  %v1475_v40 = vmul.f32 1.442695, %v1401_v59  ;;  %v1477_v48 = vmul.f32 1.442695, %v1402_v14  ;;  %v1680_v43 = vpack.c.bf16 %v2936_v17, %v2932_v11 }
 0x386   : > { %2947 = vpow2.f32 %v1473_v41  ;;  %v1586_v50 = vadd.f32 %v2936_v17, %v2934_v15 }
 0x387   : > { %v2938_v54 = vpop.eup %2937  ;;  %2949 = vpow2.f32 %v1475_v40  ;;  %1759 = vmatprep.mubr.bf16.mxu0 %v1680_v43 }
 0x388   : > { %v2940_v16 = vpop.eup %2939  ;;  %2951 = vpow2.f32 %v1477_v48  ;;  %1587 = vadd.xlane.f32.xlu1 %v1586_v50  ;;  %1760 = vmatmul.mubr.bf16.vlgmr.msra.gmra.mrb[64].mxu0 %v1679_v63  ;;  %v1315_v56 = vpop.xlane.xlu0 %1314 }
 0x389   : > { %v1403_v55 = vsub.f32 %v3912_v3, %v1315_v56  ;;  %v1404_v62 = vsub.f32 %v3914_v8, %v1315_v56  ;;  %v1589_v23 = vadd.f32 %v2940_v16, %v2938_v54 }
 0x38a   : > { %v1318_v9 = vpop.xlane.xlu1 %1317 }
 0x38b   : > { %v2942_v51 = vpop.eup %2941  ;;  %v1479_v52 = vmul.f32 1.442695, %v1403_v55  ;;  %v1481_v37 = vmul.f32 1.442695, %v1404_v62  ;;  %v1405_v11 = vsub.f32 %v3916_v53, %v1318_v9  ;;  %v1406_v49 = vsub.f32 %v3920_v60, %v1318_v9  ;;  %1590 = vadd.xlane.f32.xlu0 %v1589_v23 }
 0x38c   : > { %v2944_v4 = vpop.eup %2943  ;;  %v1681_v7 = vpack.c.bf16 %v2942_v51, %v2938_v54 }
 0x38d   : > { %2953 = vpow2.f32 %v1479_v52  ;;  %v1483_v15 = vmul.f32 1.442695, %v1405_v11  ;;  %v1485_v58 = vmul.f32 1.442695, %v1406_v49  ;;  %v1682_v41 = vpack.c.bf16 %v2944_v4, %v2940_v16 }
 0x38e   : > { %2955 = vpow2.f32 %v1481_v37  ;;  %v1592_v3 = vadd.f32 %v2944_v4, %v2942_v51 }
 0x38f   : > { %v2946_v59 = vpop.eup %2945  ;;  %2957 = vpow2.f32 %v1483_v15  ;;  %1767 = vmatprep.mubr.bf16.mxu0 %v1682_v41 }
 0x390   : > { %v2948_v8 = vpop.eup %2947  ;;  %2959 = vpow2.f32 %v1485_v58  ;;  %1593 = vadd.xlane.f32.xlu1 %v1592_v3  ;;  %1768 = vmatmul.mubr.bf16.gmra.mrb[68].mxu0 %v1681_v7  ;;  %v1321_v14 = vpop.xlane.xlu0 %1320 }
 0x391   : > { %v2950_v53 = vpop.eup %2949  ;;  %v1407_v60 = vsub.f32 %v3924_v31, %v1321_v14  ;;  %v1408_v17 = vsub.f32 %v3926_v10, %v1321_v14  ;;  %v1595_v63 = vadd.f32 %v2948_v8, %v2946_v59 }
 0x392   : > { %v2952_v40 = vpop.eup %2951  ;;  %v1324_v48 = vpop.xlane.xlu1 %1323  ;;  %v1683_v43 = vpack.c.bf16 %v2950_v53, %v2946_v59 }
 0x393   : > { %v1487_v50 = vmul.f32 1.442695, %v1407_v60  ;;  %v1489_v54 = vmul.f32 1.442695, %v1408_v17  ;;  %v1409_v16 = vsub.f32 %v3928_v34, %v1324_v48  ;;  %v1410_v56 = vsub.f32 %v3932_v25, %v1324_v48  ;;  %1596 = vadd.xlane.f32.xlu0 %v1595_v63 }
 0x394   : > { %v1684_v55 = vpack.c.bf16 %v2952_v40, %v2948_v8  ;;  %v1598_v62 = vadd.f32 %v2952_v40, %v2950_v53 }
 0x395   : > { %2961 = vpow2.f32 %v1487_v50  ;;  %v1491_v23 = vmul.f32 1.442695, %v1409_v16  ;;  %v1493_v9 = vmul.f32 1.442695, %v1410_v56 }
 0x396   : > { %2963 = vpow2.f32 %v1489_v54  ;;  %1775 = vmatprep.mubr.bf16.mxu0 %v1684_v55  ;;  %1599 = vadd.xlane.f32.xlu1 %v1598_v62  ;;  %v2921_v62 = vld [vmem:[#allocation8] sm:$0xff]  }
 0x397   : > { %v2954_v31 = vpop.eup %2953  ;;  %2965 = vpow2.f32 %v1491_v23  ;;  %2739 = vmatprep.subr.bf16.mxu1 %v2921_v62 }
 0x398   : > { %v2956_v10 = vpop.eup %2955  ;;  %2967 = vpow2.f32 %v1493_v9  ;;  %1776 = vmatmul.mubr.bf16.gmra.mrb[72].mxu0 %v1683_v43  ;;  %v1327_v51 = vpop.xlane.xlu0 %1326  ;;  %2740 = vmatpush3.bf16.msra.mxu1 %v2921_v62 }
 0x399   : > { %v2958_v52 = vpop.eup %2957  ;;  %v1411_v34 = vsub.f32 %v3936_v29, %v1327_v51  ;;  %v1412_v25 = vsub.f32 %v3938_v35, %v1327_v51  ;;  %v1601_v37 = vadd.f32 %v2956_v10, %v2954_v31 }
 0x39a   : > { %v2960_v11 = vpop.eup %2959  ;;  %v1330_v49 = vpop.xlane.xlu1 %1329  ;;  %v1685_v4 = vpack.c.bf16 %v2958_v52, %v2954_v31 }
 0x39b   : > { %v1495_v7 = vmul.f32 1.442695, %v1411_v34  ;;  %v1497_v15 = vmul.f32 1.442695, %v1412_v25  ;;  %v1413_v58 = vsub.f32 %v3940_v1, %v1330_v49  ;;  %v1414_v41 = vsub.f32 %v3944_v5, %v1330_v49  ;;  %1602 = vadd.xlane.f32.xlu0 %v1601_v37 }
 0x39c   : > { %v1686_v3 = vpack.c.bf16 %v2960_v11, %v2956_v10  ;;  %v1604_v59 = vadd.f32 %v2960_v11, %v2958_v52 }
 0x39d   : > { %2969 = vpow2.f32 %v1495_v7  ;;  %v1499_v8 = vmul.f32 1.442695, %v1413_v58  ;;  %v1501_v14 = vmul.f32 1.442695, %v1414_v41 }
 0x39e   : > { %2971 = vpow2.f32 %v1497_v15  ;;  %1783 = vmatprep.mubr.bf16.mxu0 %v1686_v3  ;;  %1605 = vadd.xlane.f32.xlu1 %v1604_v59 }
 0x39f   : > { %v2962_v29 = vpop.eup %2961  ;;  %2973 = vpow2.f32 %v1499_v8 }
 0x3a0   : > { %v2964_v35 = vpop.eup %2963  ;;  %2975 = vpow2.f32 %v1501_v14  ;;  %1784 = vmatmul.mubr.bf16.gmra.mrb[76].mxu0 %v1685_v4  ;;  %v1333_v53 = vpop.xlane.xlu0 %1332 }
 0x3a1   : > { %v2966_v60 = vpop.eup %2965  ;;  %v1415_v1 = vsub.f32 %v3948_v36, %v1333_v53  ;;  %v1416_v5 = vsub.f32 %v3950_v44, %v1333_v53  ;;  %v1607_v17 = vadd.f32 %v2964_v35, %v2962_v29 }
 0x3a2   : > { %v2968_v63 = vpop.eup %2967  ;;  %v1336_v40 = vpop.xlane.xlu1 %1335  ;;  %v1687_v48 = vpack.c.bf16 %v2966_v60, %v2962_v29 }
 0x3a3   : > { %v1503_v43 = vmul.f32 1.442695, %v1415_v1  ;;  %v1505_v50 = vmul.f32 1.442695, %v1416_v5  ;;  %v1417_v54 = vsub.f32 %v3952_v19, %v1336_v40  ;;  %v1418_v16 = vsub.f32 %v3956_v39, %v1336_v40  ;;  %1608 = vadd.xlane.f32.xlu0 %v1607_v17  ;;  %v2922_v40 = vld [vmem:[#allocation8 + $0x8] sm:$0xff]  }
 0x3a4   : > { %v1688_v56 = vpack.c.bf16 %v2968_v63, %v2964_v35  ;;  %v1610_v55 = vadd.f32 %v2968_v63, %v2966_v60  ;;  %2741 = vmatprep.subr.bf16.mxu1 %v2922_v40 }
 0x3a5   : > { %2977 = vpow2.f32 %v1503_v43  ;;  %v1507_v23 = vmul.f32 1.442695, %v1417_v54  ;;  %v1509_v9 = vmul.f32 1.442695, %v1418_v16  ;;  %2742 = vmatpush3.bf16.msra.mxu1 %v2922_v40 }
 0x3a6   : > { %2979 = vpow2.f32 %v1505_v50  ;;  %1791 = vmatprep.mubr.bf16.mxu0 %v1688_v56  ;;  %1611 = vadd.xlane.f32.xlu1 %v1610_v55 }
 0x3a7   : > { %v2970_v36 = vpop.eup %2969  ;;  %2981 = vpow2.f32 %v1507_v23 }
 0x3a8   : > { %v2972_v44 = vpop.eup %2971  ;;  %2983 = vpow2.f32 %v1509_v9  ;;  %1792 = vmatmul.mubr.bf16.gmra.mrb[80].mxu0 %v1687_v48  ;;  %v1339_v31 = vpop.xlane.xlu0 %1338 }
 0x3a9   : > { %v2974_v19 = vpop.eup %2973  ;;  %v1419_v39 = vsub.f32 %v3960_v21, %v1339_v31  ;;  %v1420_v10 = vsub.f32 %v3962_v33, %v1339_v31  ;;  %v1613_v51 = vadd.f32 %v2972_v44, %v2970_v36 }
 0x3aa   : > { %v2976_v52 = vpop.eup %2975  ;;  %v1342_v34 = vpop.xlane.xlu1 %1341  ;;  %v1689_v25 = vpack.c.bf16 %v2974_v19, %v2970_v36 }
 0x3ab   : > { %v1511_v37 = vmul.f32 1.442695, %v1419_v39  ;;  %v1513_v11 = vmul.f32 1.442695, %v1420_v10  ;;  %v1421_v49 = vsub.f32 %v3964_v27, %v1342_v34  ;;  %v1422_v4 = vsub.f32 %v3968_v47, %v1342_v34  ;;  %1614 = vadd.xlane.f32.xlu0 %v1613_v51 }
 0x3ac   : > { %v1690_v7 = vpack.c.bf16 %v2976_v52, %v2972_v44  ;;  %v1616_v15 = vadd.f32 %v2976_v52, %v2974_v19 }
 0x3ad   : > { %2985 = vpow2.f32 %v1511_v37  ;;  %v1515_v58 = vmul.f32 1.442695, %v1421_v49  ;;  %v1517_v41 = vmul.f32 1.442695, %v1422_v4 }
 0x3ae   : > { %2987 = vpow2.f32 %v1513_v11  ;;  %1799 = vmatprep.mubr.bf16.mxu0 %v1690_v7  ;;  %1617 = vadd.xlane.f32.xlu1 %v1616_v15 }
 0x3af   : > { %v2978_v33 = vpop.eup %2977  ;;  %2989 = vpow2.f32 %v1515_v58 }
 0x3b0   : > { %v2980_v21 = vpop.eup %2979  ;;  %2991 = vpow2.f32 %v1517_v41  ;;  %1800 = vmatmul.mubr.bf16.gmra.mrb[84].mxu0 %v1689_v25  ;;  %v1345_v3 = vpop.xlane.xlu0 %1344 }
 0x3b1   : > { %v2982_v59 = vpop.eup %2981  ;;  %v1423_v27 = vsub.f32 %v3972_v2, %v1345_v3  ;;  %v1424_v47 = vsub.f32 %v3974_v42, %v1345_v3  ;;  %v1619_v8 = vadd.f32 %v2980_v21, %v2978_v33 }
 0x3b2   : > { %v2984_v14 = vpop.eup %2983  ;;  %v1348_v29 = vpop.xlane.xlu1 %1347  ;;  %v1691_v35 = vpack.c.bf16 %v2982_v59, %v2978_v33  ;;  %v2923_v33 = vld [vmem:[#allocation8 + $0x10] sm:$0xff]  }
 0x3b3   : > { %v1519_v53 = vmul.f32 1.442695, %v1423_v27  ;;  %v1521_v60 = vmul.f32 1.442695, %v1424_v47  ;;  %v1425_v1 = vsub.f32 %v3976_v32, %v1348_v29  ;;  %v1426_v5 = vsub.f32 %v3980_v0, %v1348_v29  ;;  %1620 = vadd.xlane.f32.xlu0 %v1619_v8  ;;  %2743 = vmatprep.subr.bf16.mxu1 %v2923_v33 }
 0x3b4   : > { %v1692_v17 = vpack.c.bf16 %v2984_v14, %v2980_v21  ;;  %v1622_v63 = vadd.f32 %v2984_v14, %v2982_v59  ;;  %2744 = vmatpush3.bf16.msra.mxu1 %v2923_v33 }
 0x3b5   : > { %2993 = vpow2.f32 %v1519_v53  ;;  %v1523_v48 = vmul.f32 1.442695, %v1425_v1  ;;  %v1525_v43 = vmul.f32 1.442695, %v1426_v5 }
 0x3b6   : > { %2995 = vpow2.f32 %v1521_v60  ;;  %1807 = vmatprep.mubr.bf16.mxu0 %v1692_v17  ;;  %1623 = vadd.xlane.f32.xlu1 %v1622_v63 }
 0x3b7   : > { %v2986_v42 = vpop.eup %2985  ;;  %2997 = vpow2.f32 %v1523_v48 }
 0x3b8   : > { %v2988_v2 = vpop.eup %2987  ;;  %2999 = vpow2.f32 %v1525_v43  ;;  %1808 = vmatmul.mubr.bf16.gmra.mrb[88].mxu0 %v1691_v35  ;;  %v1351_v50 = vpop.xlane.xlu0 %1350 }
 0x3b9   : > { %v2990_v32 = vpop.eup %2989  ;;  %v1427_v0 = vsub.f32 %v3984_v28, %v1351_v50  ;;  %v1428_v54 = vsub.f32 %v3986_v38, %v1351_v50  ;;  %v1625_v16 = vadd.f32 %v2988_v2, %v2986_v42 }
 0x3ba   : > { %v2992_v56 = vpop.eup %2991  ;;  %v1354_v55 = vpop.xlane.xlu1 %1353  ;;  %v1693_v62 = vpack.c.bf16 %v2990_v32, %v2986_v42 }
 0x3bb   : > { %v1527_v23 = vmul.f32 1.442695, %v1427_v0  ;;  %v1529_v9 = vmul.f32 1.442695, %v1428_v54  ;;  %v1429_v36 = vsub.f32 %v3988_v46, %v1354_v55  ;;  %v1430_v44 = vsub.f32 %v3992_v12, %v1354_v55  ;;  %1626 = vadd.xlane.f32.xlu0 %v1625_v16  ;;  %v4405_v16 = vld [vmem:[#allocation48_spill] sm:$0xff]  ;;  %v4406_v55 = vld [vmem:[#allocation49_spill] sm:$0xff] }
 0x3bc   : > { %v1694_v31 = vpack.c.bf16 %v2992_v56, %v2988_v2  ;;  %v1628_v19 = vadd.f32 %v2992_v56, %v2990_v32 }
 0x3bd   : > { %3001 = vpow2.f32 %v1527_v23  ;;  %v1531_v39 = vmul.f32 1.442695, %v1429_v36  ;;  %v1533_v10 = vmul.f32 1.442695, %v1430_v44  ;;  %v2924_v36 = vld [vmem:[#allocation8 + $0x18] sm:$0xff]  }
 0x3be   : > { %3003 = vpow2.f32 %v1529_v9  ;;  %1815 = vmatprep.mubr.bf16.mxu0 %v1694_v31  ;;  %1629 = vadd.xlane.f32.xlu1 %v1628_v19 }
 0x3bf   : > { %v2994_v38 = vpop.eup %2993  ;;  %3005 = vpow2.f32 %v1531_v39  ;;  %2745 = vmatprep.subr.bf16.mxu1 %v2924_v36 }
 0x3c0   : > { %v2996_v28 = vpop.eup %2995  ;;  %3007 = vpow2.f32 %v1533_v10  ;;  %1816 = vmatmul.mubr.bf16.gmra.mrb[92].mxu0 %v1693_v62  ;;  %v1357_v51 = vpop.xlane.xlu0 %1356  ;;  %2746 = vmatpush3.bf16.msra.mxu1 %v2924_v36  ;;  %v4407_v10 = vld [vmem:[#allocation50_spill] sm:$0xff] }
 0x3c1   : > { %v2998_v52 = vpop.eup %2997  ;;  %v1431_v46 = vsub.f32 %v3996_v20, %v1357_v51  ;;  %v1432_v12 = vsub.f32 %v3998_v6, %v1357_v51  ;;  %v1631_v34 = vadd.f32 %v2996_v28, %v2994_v38 }
 0x3c2   : > { %v3000_v25 = vpop.eup %2999  ;;  %v1360_v37 = vpop.xlane.xlu1 %1359  ;;  %v1695_v11 = vpack.c.bf16 %v2998_v52, %v2994_v38 }
 0x3c3   : > { %v1535_v49 = vmul.f32 1.442695, %v1431_v46  ;;  %v1537_v4 = vmul.f32 1.442695, %v1432_v12  ;;  %v1433_v7 = vsub.f32 %v4000_v18, %v1360_v37  ;;  %v1434_v15 = vsub.f32 %v4004_v26, %v1360_v37  ;;  %1632 = vadd.xlane.f32.xlu0 %v1631_v34 }
 0x3c4   : > { %v1696_v58 = vpack.c.bf16 %v3000_v25, %v2996_v28  ;;  %v1634_v41 = vadd.f32 %v3000_v25, %v2998_v52  ;;  %v4408_v28 = vld [vmem:[#allocation51_spill] sm:$0xff] }
 0x3c5   : > { %3009 = vpow2.f32 %v1535_v49  ;;  %v1539_v21 = vmul.f32 1.442695, %v1433_v7  ;;  %v1541_v3 = vmul.f32 1.442695, %v1434_v15 }
 0x3c6   : > { %3011 = vpow2.f32 %v1537_v4  ;;  %1823 = vmatprep.mubr.bf16.mxu0 %v1696_v58  ;;  %1635 = vadd.xlane.f32.xlu1 %v1634_v41  ;;  %v4410_v4 = vld [vmem:[#allocation53_spill] sm:$0xff]  ;;  %v2925_v41 = vld [vmem:[#allocation8 + $0x20] sm:$0xff]  }
 0x3c7   : > { %v3002_v6 = vpop.eup %3001  ;;  %3013 = vpow2.f32 %v1539_v21  ;;  %2747 = vmatprep.subr.bf16.mxu1 %v2925_v41 }
 0x3c8   : > { %v3004_v20 = vpop.eup %3003  ;;  %3015 = vpow2.f32 %v1541_v3  ;;  %1824 = vmatmul.mubr.bf16.gmra.mrb[96].mxu0 %v1695_v11  ;;  %v1363_v59 = vpop.xlane.xlu0 %1362  ;;  %v4409_v11 = vld [vmem:[#allocation52_spill] sm:$0xff]  ;;  %2748 = vmatpush3.bf16.msra.mxu1 %v2925_v41 }
 0x3c9   : > { %v3006_v18 = vpop.eup %3005  ;;  %v1435_v26 = vsub.f32 %v4008_v13, %v1363_v59  ;;  %v1436_v27 = vsub.f32 %v4010_v61, %v1363_v59  ;;  %v1637_v47 = vadd.f32 %v3004_v20, %v3002_v6  ;;  %v2926_v59 = vld [vmem:[#allocation8 + $0x28] sm:$0xff]  }
 0x3ca   : > { %v3008_v8 = vpop.eup %3007  ;;  %v1366_v14 = vpop.xlane.xlu1 %1365  ;;  %v1697_v29 = vpack.c.bf16 %v3006_v18, %v3002_v6  ;;  %2749 = vmatprep.subr.bf16.mxu1 %v2926_v59 }
 0x3cb   : > { %v1543_v35 = vmul.f32 1.442695, %v1435_v26  ;;  %v1545_v53 = vmul.f32 1.442695, %v1436_v27  ;;  %v1437_v60 = vsub.f32 %v4012_v24, %v1366_v14  ;;  %v1438_v1 = vsub.f32 %v4016_v22, %v1366_v14  ;;  %1638 = vadd.xlane.f32.xlu0 %v1637_v47  ;;  %v4411_v26 = vld [vmem:[#allocation54_spill] sm:$0xff]  ;;  %v4412_v47 = vld [vmem:[#allocation55_spill] sm:$0xff] }
 0x3cc   : > { %v1698_v5 = vpack.c.bf16 %v3008_v8, %v3004_v20  ;;  %v1640_v17 = vadd.f32 %v3008_v8, %v3006_v18  ;;  %2750 = vmatpush3.bf16.msra.mxu1 %v2926_v59 }
 0x3cd   : > { %3017 = vpow2.f32 %v1543_v35  ;;  %v1547_v63 = vmul.f32 1.442695, %v1437_v60  ;;  %v1549_v40 = vmul.f32 1.442695, %v1438_v1 }
 0x3ce   : > { %3019 = vpow2.f32 %v1545_v53  ;;  %1831 = vmatprep.mubr.bf16.mxu0 %v1698_v5  ;;  %1641 = vadd.xlane.f32.xlu1 %v1640_v17  ;;  %v4413_v5 = vld [vmem:[#allocation56_spill] sm:$0xff] }
 0x3cf   : > { %v3010_v61 = vpop.eup %3009  ;;  %3021 = vpow2.f32 %v1547_v63  ;;  %v4414_v63 = vld [vmem:[#allocation57_spill] sm:$0xff] }
 0x3d0   : > { %v3012_v13 = vpop.eup %3011  ;;  %3023 = vpow2.f32 %v1549_v40  ;;  %1832 = vmatmul.mubr.bf16.gmra.mrb[100].mxu0 %v1697_v29  ;;  %v1369_v48 = vpop.xlane.xlu0 %1368 }
 0x3d1   : > { %v3014_v43 = vpop.eup %3013  ;;  %v1439_v24 = vsub.f32 %v4020_v30, %v1369_v48  ;;  %v1440_v22 = vsub.f32 %v4022_v57, %v1369_v48  ;;  %v1643_v42 = vadd.f32 %v3012_v13, %v3010_v61  ;;  %v2927_v48 = vld [vmem:[#allocation8 + $0x30] sm:$0xff]  }
 0x3d2   : > { %v3016_v2 = vpop.eup %3015  ;;  %v1372_v50 = vpop.xlane.xlu1 %1371  ;;  %v1699_v32 = vpack.c.bf16 %v3014_v43, %v3010_v61  ;;  %2751 = vmatprep.subr.bf16.mxu1 %v2927_v48 }
 0x3d3   : > { %v1551_v0 = vmul.f32 1.442695, %v1439_v24  ;;  %v1553_v54 = vmul.f32 1.442695, %v1440_v22  ;;  %v1441_v56 = vsub.f32 %v4405_v16, %v1372_v50  ;;  %v1442_v62 = vsub.f32 %v4406_v55, %v1372_v50  ;;  %1644 = vadd.xlane.f32.xlu0 %v1643_v42  ;;  %2752 = vmatpush3.bf16.msra.mxu1 %v2927_v48  ;;  %v2928_v50 = vld [vmem:[#allocation8 + $0x38] sm:$0xff]  }
 0x3d4   : > { %v1700_v23 = vpack.c.bf16 %v3016_v2, %v3012_v13  ;;  %v1646_v9 = vadd.f32 %v3016_v2, %v3014_v43  ;;  %v4416_v16 = vld [vmem:[#allocation59_spill] sm:$0xff]  ;;  %2753 = vmatprep.subr.bf16.mxu1 %v2928_v50 }
 0x3d5   : > { %3025 = vpow2.f32 %v1551_v0  ;;  %v1555_v44 = vmul.f32 1.442695, %v1441_v56  ;;  %v1557_v31 = vmul.f32 1.442695, %v1442_v62  ;;  %v4415_v0 = vld [vmem:[#allocation58_spill] sm:$0xff] }
 0x3d6   : > { %3027 = vpow2.f32 %v1553_v54  ;;  %1839 = vmatprep.mubr.bf16.mxu0 %v1700_v23  ;;  %1647 = vadd.xlane.f32.xlu1 %v1646_v9 }
 0x3d7   : > { %v3018_v57 = vpop.eup %3017  ;;  %3029 = vpow2.f32 %v1555_v44  ;;  %2754 = vmatpush3.bf16.msra.mxu1 %v2928_v50 }
 0x3d8   : > { %v3020_v30 = vpop.eup %3019  ;;  %3031 = vpow2.f32 %v1557_v31  ;;  %1840 = vmatmul.mubr.bf16.gmra.mrb[104].mxu0 %v1699_v32  ;;  %v1375_v19 = vpop.xlane.xlu0 %1374 }
 0x3d9   : > { %v3022_v39 = vpop.eup %3021  ;;  %v1443_v38 = vsub.f32 %v4407_v10, %v1375_v19  ;;  %v1444_v51 = vsub.f32 %v4408_v28, %v1375_v19  ;;  %v1649_v52 = vadd.f32 %v3020_v30, %v3018_v57 }
 0x3da   : > { %v3024_v46 = vpop.eup %3023  ;;  %v1378_v12 = vpop.xlane.xlu1 %1377  ;;  %v1701_v34 = vpack.c.bf16 %v3022_v39, %v3018_v57  ;;  %v4417_v57 = vld [vmem:[#allocation60_spill] sm:$0xff] }
 0x3db   : > { %v1559_v25 = vmul.f32 1.442695, %v1443_v38  ;;  %v1561_v37 = vmul.f32 1.442695, %v1444_v51  ;;  %v1445_v49 = vsub.f32 %v4409_v11, %v1378_v12  ;;  %v1446_v7 = vsub.f32 %v4410_v4, %v1378_v12  ;;  %1650 = vadd.xlane.f32.xlu0 %v1649_v52 }
 0x3dc   : > { %v1702_v15 = vpack.c.bf16 %v3024_v46, %v3020_v30  ;;  %v1652_v58 = vadd.f32 %v3024_v46, %v3022_v39 }
 0x3dd   : > { %3033 = vpow2.f32 %v1559_v25  ;;  %v1563_v33 = vmul.f32 1.442695, %v1445_v49  ;;  %v1565_v21 = vmul.f32 1.442695, %v1446_v7 }
 0x3de   : > { %3035 = vpow2.f32 %v1561_v37  ;;  %1847 = vmatprep.mubr.bf16.mxu0 %v1702_v15  ;;  %1653 = vadd.xlane.f32.xlu1 %v1652_v58 }
 0x3df   : > { %v3026_v3 = vpop.eup %3025  ;;  %3037 = vpow2.f32 %v1563_v33 }
 0x3e0   : > { %v3028_v6 = vpop.eup %3027  ;;  %3039 = vpow2.f32 %v1565_v21  ;;  %1848 = vmatmul.mubr.bf16.gmra.mrb[108].mxu0 %v1701_v34  ;;  %v1381_v20 = vpop.xlane.xlu0 %1380 }
 0x3e1   : > { %v3030_v18 = vpop.eup %3029  ;;  %v1447_v27 = vsub.f32 %v4411_v26, %v1381_v20  ;;  %v1448_v8 = vsub.f32 %v4412_v47, %v1381_v20  ;;  %v1655_v14 = vadd.f32 %v3028_v6, %v3026_v3 }
 0x3e2   : > { %v3032_v29 = vpop.eup %3031  ;;  %v1384_v35 = vpop.xlane.xlu1 %1383  ;;  %v1703_v53 = vpack.c.bf16 %v3030_v18, %v3026_v3 }
 0x3e3   : > { %v1567_v60 = vmul.f32 1.442695, %v1447_v27  ;;  %v1569_v1 = vmul.f32 1.442695, %v1448_v8  ;;  %v1449_v17 = vsub.f32 %v4413_v5, %v1384_v35  ;;  %v1450_v40 = vsub.f32 %v4414_v63, %v1384_v35  ;;  %1656 = vadd.xlane.f32.xlu0 %v1655_v14 }
 0x3e4   : > { %v1704_v61 = vpack.c.bf16 %v3032_v29, %v3028_v6  ;;  %v1658_v13 = vadd.f32 %v3032_v29, %v3030_v18 }
 0x3e5   : > { %3041 = vpow2.f32 %v1567_v60  ;;  %v1571_v43 = vmul.f32 1.442695, %v1449_v17  ;;  %v1573_v24 = vmul.f32 1.442695, %v1450_v40 }
 0x3e6   : > { %3043 = vpow2.f32 %v1569_v1  ;;  %1855 = vmatprep.mubr.bf16.mxu0 %v1704_v61  ;;  %1659 = vadd.xlane.f32.xlu1 %v1658_v13 }
 0x3e7   : > { %v3034_v22 = vpop.eup %3033  ;;  %3045 = vpow2.f32 %v1571_v43 }
 0x3e8   : > { %v3036_v42 = vpop.eup %3035  ;;  %3047 = vpow2.f32 %v1573_v24  ;;  %1856 = vmatmul.mubr.bf16.gmra.mrb[112].mxu0 %v1703_v53  ;;  %v1387_v2 = vpop.xlane.xlu0 %1386 }
 0x3e9   : > { %v3038_v32 = vpop.eup %3037  ;;  %v1451_v54 = vsub.f32 %v4415_v0, %v1387_v2  ;;  %v1452_v56 = vsub.f32 %v4416_v16, %v1387_v2  ;;  %v1661_v55 = vadd.f32 %v3036_v42, %v3034_v22 }
 0x3ea   : > { %v3040_v62 = vpop.eup %3039  ;;  %v1390_v23 = vpop.xlane.xlu1 %1389  ;;  %v1705_v9 = vpack.c.bf16 %v3038_v32, %v3034_v22 }
 0x3eb   : > { %v1575_v36 = vmul.f32 1.442695, %v1451_v54  ;;  %v1577_v44 = vmul.f32 1.442695, %v1452_v56  ;;  %1662 = vadd.xlane.f32.xlu0 %v1661_v55  ;;  %v1453_v31 = vsub.f32 %v4060_v45, %v1390_v23  ;;  %v1454_v30 = vsub.f32 %v4417_v57, %v1390_v23 }
 0x3ec   : > { %v1706_v19 = vpack.c.bf16 %v3040_v62, %v3036_v42  ;;  %v1664_v39 = vadd.f32 %v3040_v62, %v3038_v32 }
 0x3ed   : > { %3049 = vpow2.f32 %v1575_v36  ;;  %v1579_v10 = vmul.f32 1.442695, %v1453_v31  ;;  %v1581_v38 = vmul.f32 1.442695, %v1454_v30 }
 0x3ee   : > { %3051 = vpow2.f32 %v1577_v44  ;;  %1863 = vmatprep.mubr.bf16.mxu0 %v1706_v19  ;;  %1665 = vadd.xlane.f32.xlu1 %v1664_v39 }
 0x3ef   : > { %v3042_v28 = vpop.eup %3041  ;;  %3053 = vpow2.f32 %v1579_v10 }
 0x3f0   : > { %v3044_v51 = vpop.eup %3043  ;;  %3055 = vpow2.f32 %v1581_v38  ;;  %1864 = vmatmul.mubr.bf16.gmra.mrb[116].mxu0 %v1705_v9 }
 0x3f1   : > { %v3046_v52 = vpop.eup %3045  ;;  %v1667_v46 = vadd.f32 %v3044_v51, %v3042_v28 }
 0x3f2   : > { %v3048_v12 = vpop.eup %3047  ;;  %v1707_v45 = vpack.c.bf16 %v3046_v52, %v3042_v28 }
 0x3f3   : > { %1668 = vadd.xlane.f32.xlu0 %v1667_v46  ;;  %v1708_v34 = vpack.c.bf16 %v3048_v12, %v3044_v51  ;;  %v1670_v25 = vadd.f32 %v3048_v12, %v3046_v52 }
 0x3f5   : > { %1871 = vmatprep.mubr.bf16.mxu0 %v1708_v34  ;;  %1671 = vadd.xlane.f32.xlu1 %v1670_v25 }
 0x3f7   : > { %v3050_v37 = vpop.eup %3049 }
 0x3f8   : > { %v3052_v11 = vpop.eup %3051  ;;  %1872 = vmatmul.mubr.bf16.gmra.mrb[120].mxu0 %v1707_v45 }
 0x3f9   : > { %v3054_v49 = vpop.eup %3053  ;;  %v1673_v4 = vadd.f32 %v3052_v11, %v3050_v37 }
 0x3fa   : > { %v3056_v7 = vpop.eup %3055  ;;  %v1709_v15 = vpack.c.bf16 %v3054_v49, %v3050_v37 }
 0x3fb   : > { %1674 = vadd.xlane.f32.xlu0 %v1673_v4  ;;  %v1710_v58 = vpack.c.bf16 %v3056_v7, %v3052_v11  ;;  %v1676_v41 = vadd.f32 %v3056_v7, %v3054_v49 }
 0x3fd   : > { %1879 = vmatprep.mubr.bf16.mxu0 %v1710_v58  ;;  %1677 = vadd.xlane.f32.xlu1 %v1676_v41 }
 0x400   : > { %1880 = vmatmul.mubr.bf16.gmra.mrb[124].mxu0 %v1709_v15 }
 0x410   : > { %v1585_v33 = vpop.xlane.xlu0 %1584 }
 0x411   : > { %3057 = vrcp.f32 %v1585_v33 }
 0x415   : > { %v1588_v21 = vpop.xlane.xlu1 %1587 }
 0x416   : > { %3059 = vrcp.f32 %v1588_v21 }
 0x418   : > { %v1591_v3 = vpop.xlane.xlu0 %1590 }
 0x419   : > { %3061 = vrcp.f32 %v1591_v3 }
 0x41b   : > { %v3058_v47 = vpop.eup %3057 }
 0x41d   : > { %v1594_v6 = vpop.xlane.xlu1 %1593 }
 0x41e   : > { %3063 = vrcp.f32 %v1594_v6 }
 0x420   : > { %v3060_v14 = vpop.eup %3059  ;;  %v1597_v53 = vpop.xlane.xlu0 %1596 }
 0x421   : > { %3065 = vrcp.f32 %v1597_v53 }
 0x423   : > { %v1600_v60 = vpop.xlane.xlu1 %1599  ;;  %v3062_v13 = vpop.eup %3061 }
 0x424   : > { %3067 = vrcp.f32 %v1600_v60 }
 0x428   : > { %v3064_v43 = vpop.eup %3063  ;;  %v1603_v42 = vpop.xlane.xlu0 %1602 }
 0x429   : > { %3069 = vrcp.f32 %v1603_v42 }
 0x42b   : > { %v1606_v2 = vpop.xlane.xlu1 %1605  ;;  %v3066_v55 = vpop.eup %3065 }
 0x42c   : > { %3071 = vrcp.f32 %v1606_v2 }
 0x42e   : > { %v3068_v23 = vpop.eup %3067 }
 0x430   : > { %v1609_v44 = vpop.xlane.xlu0 %1608 }
 0x431   : > { %3073 = vrcp.f32 %v1609_v44 }
 0x433   : > { %v1612_v31 = vpop.xlane.xlu1 %1611  ;;  %v3070_v28 = vpop.eup %3069 }
 0x434   : > { %3075 = vrcp.f32 %v1612_v31 }
 0x436   : > { %v3072_v52 = vpop.eup %3071 }
 0x438   : > { %v1615_v45 = vpop.xlane.xlu0 %1614 }
 0x439   : > { %3077 = vrcp.f32 %v1615_v45 }
 0x43b   : > { %v1618_v34 = vpop.xlane.xlu1 %1617  ;;  %v3074_v15 = vpop.eup %3073 }
 0x43c   : > { %3079 = vrcp.f32 %v1618_v34 }
 0x43e   : > { %v3076_v41 = vpop.eup %3075 }
 0x440   : > { %v1621_v3 = vpop.xlane.xlu0 %1620 }
 0x441   : > { %3081 = vrcp.f32 %v1621_v3 }
 0x443   : > { %v1624_v6 = vpop.xlane.xlu1 %1623 }
 0x444   : > { %3083 = vrcp.f32 %v1624_v6 }
 0x448   : > { %v1627_v60 = vpop.xlane.xlu0 %1626 }
 0x449   : > { %3085 = vrcp.f32 %v1627_v60 }
 0x450   : > { %v1633_v2 = vpop.xlane.xlu0 %1632 }
 0x458   : > { %v1639_v31 = vpop.xlane.xlu0 %1638 }
 0x45b   : > { %v2571_v20 = vpop.f32.mrb[64].mxu0 }
 0x45c   : > { %v2572_v59 = vpop.f32.mrb[65].mxu0 }
 0x45d   : > { %v2573_v18 = vadd.f32 %v2572_v59, %v2571_v20  ;;  %v2574_v26 = vpop.f32.mrb[66].mxu0 }
 0x45e   : > { %v2575_v27 = vpop.f32.mrb[67].mxu0 }
 0x45f   : > { %v2576_v8 = vadd.f32 %v2575_v27, %v2574_v26  ;;  %v1920_v29 = vmul.f32 %v3058_v47, %v2573_v18 }
 0x460   : > { %v1645_v34 = vpop.xlane.xlu0 %1644 }
 0x461   : > { %v1921_v35 = vmul.f32 %v3060_v14, %v2576_v8  ;;  %v3078_v8 = vpop.eup %3077 }
 0x463   : > { %v2577_v1 = vpop.f32.mrb[68].mxu0  ;;  %v1952_v5 = vpack.c.bf16 %v1921_v35, %v1920_v29  ;;  %v3080_v29 = vpop.eup %3079 }
 0x464   : > { %v2578_v17 = vpop.f32.mrb[69].mxu0 }
 0x465   : > { %v2579_v63 = vadd.f32 %v2578_v17, %v2577_v1  ;;  %v2580_v40 = vpop.f32.mrb[70].mxu0  ;;  %2755 = vmatprep.mubr.bf16.mxu1 %v1952_v5  ;;  %v1630_v1 = vpop.xlane.xlu1 %1629 }
 0x466   : > { %v2581_v61 = vpop.f32.mrb[71].mxu0  ;;  %3087 = vrcp.f32 %v1630_v1 }
 0x467   : > { %v2582_v48 = vadd.f32 %v2581_v61, %v2580_v40  ;;  %v1922_v24 = vmul.f32 %v3062_v13, %v2579_v63  ;;  %3089 = vrcp.f32 %v1633_v2 }
 0x468   : > { %v1651_v6 = vpop.xlane.xlu0 %1650 }
 0x469   : > { %v1923_v22 = vmul.f32 %v3064_v43, %v2582_v48  ;;  %v3082_v48 = vpop.eup %3081 }
 0x46b   : > { %v1953_v50 = vpack.c.bf16 %v1923_v22, %v1922_v24  ;;  %v2583_v32 = vpop.f32.mrb[72].mxu0  ;;  %v3084_v24 = vpop.eup %3083 }
 0x46c   : > { %v2584_v0 = vpop.f32.mrb[73].mxu0 }
 0x46d   : > { %v2585_v54 = vadd.f32 %v2584_v0, %v2583_v32  ;;  %v2586_v16 = vpop.f32.mrb[74].mxu0  ;;  %2756 = vmatmul.mubr.bf16.vlgmr.msra.gmra.mrb[96].mxu1 %v1953_v50  ;;  %v1636_v50 = vpop.xlane.xlu1 %1635 }
 0x46e   : > { %v2587_v56 = vpop.f32.mrb[75].mxu0  ;;  %3091 = vrcp.f32 %v1636_v50 }
 0x46f   : > { %v2588_v62 = vadd.f32 %v2587_v56, %v2586_v16  ;;  %v1924_v9 = vmul.f32 %v3066_v55, %v2585_v54  ;;  %3093 = vrcp.f32 %v1639_v31 }
 0x470   : > { %v1657_v1 = vpop.xlane.xlu0 %1656 }
 0x471   : > { %v1925_v36 = vmul.f32 %v3068_v23, %v2588_v62  ;;  %v3086_v62 = vpop.eup %3085 }
 0x473   : > { %v2589_v57 = vpop.f32.mrb[76].mxu0  ;;  %v1954_v30 = vpack.c.bf16 %v1925_v36, %v1924_v9  ;;  %v3088_v9 = vpop.eup %3087 }
 0x474   : > { %v2590_v19 = vpop.f32.mrb[77].mxu0 }
 0x475   : > { %v2591_v39 = vadd.f32 %v2590_v19, %v2589_v57  ;;  %v2592_v10 = vpop.f32.mrb[78].mxu0  ;;  %2759 = vmatprep.mubr.bf16.mxu1 %v1954_v30  ;;  %v1642_v57 = vpop.xlane.xlu1 %1641 }
 0x476   : > { %v2593_v38 = vpop.f32.mrb[79].mxu0  ;;  %3095 = vrcp.f32 %v1642_v57 }
 0x477   : > { %v2594_v51 = vadd.f32 %v2593_v38, %v2592_v10  ;;  %v1926_v46 = vmul.f32 %v3070_v28, %v2591_v39  ;;  %3097 = vrcp.f32 %v1645_v34 }
 0x478   : > { %v1663_v50 = vpop.xlane.xlu0 %1662 }
 0x479   : > { %v1927_v12 = vmul.f32 %v3072_v52, %v2594_v51  ;;  %v3090_v51 = vpop.eup %3089 }
 0x47b   : > { %v2595_v25 = vpop.f32.mrb[80].mxu0  ;;  %v1955_v37 = vpack.c.bf16 %v1927_v12, %v1926_v46  ;;  %v3092_v46 = vpop.eup %3091 }
 0x47c   : > { %v2596_v11 = vpop.f32.mrb[81].mxu0 }
 0x47d   : > { %v2597_v49 = vadd.f32 %v2596_v11, %v2595_v25  ;;  %v2598_v4 = vpop.f32.mrb[82].mxu0  ;;  %2760 = vmatmul.mubr.bf16.gmra.mrb[100].mxu1 %v1955_v37  ;;  %v1648_v25 = vpop.xlane.xlu1 %1647 }
 0x47e   : > { %v2599_v7 = vpop.f32.mrb[83].mxu0  ;;  %3099 = vrcp.f32 %v1648_v25 }
 0x47f   : > { %v2600_v58 = vadd.f32 %v2599_v7, %v2598_v4  ;;  %v1928_v33 = vmul.f32 %v3074_v15, %v2597_v49  ;;  %3101 = vrcp.f32 %v1651_v6 }
 0x480   : > { %v1669_v57 = vpop.xlane.xlu0 %1668 }
 0x481   : > { %v1929_v21 = vmul.f32 %v3076_v41, %v2600_v58  ;;  %v3094_v58 = vpop.eup %3093 }
 0x483   : > { %v2601_v20 = vpop.f32.mrb[84].mxu0  ;;  %v1956_v59 = vpack.c.bf16 %v1929_v21, %v1928_v33  ;;  %v3096_v33 = vpop.eup %3095 }
 0x484   : > { %v2602_v18 = vpop.f32.mrb[85].mxu0 }
 0x485   : > { %v2603_v26 = vadd.f32 %v2602_v18, %v2601_v20  ;;  %v2604_v27 = vpop.f32.mrb[86].mxu0  ;;  %2763 = vmatprep.mubr.bf16.mxu1 %v1956_v59  ;;  %v1654_v20 = vpop.xlane.xlu1 %1653 }
 0x486   : > { %v2605_v47 = vpop.f32.mrb[87].mxu0  ;;  %3103 = vrcp.f32 %v1654_v20 }
 0x487   : > { %v2606_v14 = vadd.f32 %v2605_v47, %v2604_v27  ;;  %v1930_v35 = vmul.f32 %v3078_v8, %v2603_v26  ;;  %3105 = vrcp.f32 %v1657_v1  ;;  %v4132_v1 = vld [vmem:[#allocation9] ss:$0 sm:$0xff] }
 0x488   : > { %v1675_v25 = vpop.xlane.xlu0 %1674 }
 0x489   : > { %v1931_v53 = vmul.f32 %v3080_v29, %v2606_v14  ;;  %v3098_v14 = vpop.eup %3097 }
 0x48b   : > { %v2607_v5 = vpop.f32.mrb[88].mxu0  ;;  %v1957_v17 = vpack.c.bf16 %v1931_v53, %v1930_v35  ;;  %v3100_v35 = vpop.eup %3099 }
 0x48c   : > { %v2608_v63 = vpop.f32.mrb[89].mxu0 }
 0x48d   : > { %v2609_v40 = vadd.f32 %v2608_v63, %v2607_v5  ;;  %v2610_v61 = vpop.f32.mrb[90].mxu0  ;;  %2764 = vmatmul.mubr.bf16.gmra.mrb[104].mxu1 %v1957_v17  ;;  %v1660_v5 = vpop.xlane.xlu1 %1659 }
 0x48e   : > { %v2611_v13 = vpop.f32.mrb[91].mxu0  ;;  %3107 = vrcp.f32 %v1660_v5 }
 0x48f   : > { %v2612_v43 = vadd.f32 %v2611_v13, %v2610_v61  ;;  %v1932_v22 = vmul.f32 %v3082_v48, %v2609_v40  ;;  %3109 = vrcp.f32 %v1663_v50  ;;  %v4420_v50 = vld [vmem:[#allocation18_spill] sm:$0xff] }
 0x491   : > { %v1933_v42 = vmul.f32 %v3084_v24, %v2612_v43  ;;  %v3102_v43 = vpop.eup %3101 }
 0x493   : > { %v2613_v32 = vpop.f32.mrb[92].mxu0  ;;  %v1958_v0 = vpack.c.bf16 %v1933_v42, %v1932_v22  ;;  %v3104_v22 = vpop.eup %3103 }
 0x494   : > { %v2614_v54 = vpop.f32.mrb[93].mxu0 }
 0x495   : > { %v2615_v16 = vadd.f32 %v2614_v54, %v2613_v32  ;;  %v2616_v56 = vpop.f32.mrb[94].mxu0  ;;  %2767 = vmatprep.mubr.bf16.mxu1 %v1958_v0  ;;  %v1666_v32 = vpop.xlane.xlu1 %1665 }
 0x496   : > { %v2617_v55 = vpop.f32.mrb[95].mxu0  ;;  %3111 = vrcp.f32 %v1666_v32 }
 0x497   : > { %v2618_v23 = vadd.f32 %v2617_v55, %v2616_v56  ;;  %v1934_v36 = vmul.f32 %v3086_v62, %v2615_v16  ;;  %3113 = vrcp.f32 %v1669_v57  ;;  %v4423_v57 = vld [vmem:[#allocation21_spill] sm:$0xff] }
 0x499   : > { %v1935_v44 = vmul.f32 %v3088_v9, %v2618_v23  ;;  %v3106_v23 = vpop.eup %3105 }
 0x49b   : > { %v2619_v30 = vpop.f32.mrb[96].mxu0  ;;  %v1959_v19 = vpack.c.bf16 %v1935_v44, %v1934_v36  ;;  %v3108_v36 = vpop.eup %3107 }
 0x49c   : > { %v2620_v39 = vpop.f32.mrb[97].mxu0 }
 0x49d   : > { %v2621_v10 = vadd.f32 %v2620_v39, %v2619_v30  ;;  %v2622_v38 = vpop.f32.mrb[98].mxu0  ;;  %2768 = vmatmul.mubr.bf16.gmra.mrb[108].mxu1 %v1959_v19  ;;  %v1672_v30 = vpop.xlane.xlu1 %1671 }
 0x49e   : > { %v2623_v28 = vpop.f32.mrb[99].mxu0  ;;  %3115 = vrcp.f32 %v1672_v30 }
 0x49f   : > { %v2624_v52 = vadd.f32 %v2623_v28, %v2622_v38  ;;  %v1936_v12 = vmul.f32 %v3090_v51, %v2621_v10  ;;  %3117 = vrcp.f32 %v1675_v25 }
 0x4a1   : > { %v1937_v45 = vmul.f32 %v3092_v46, %v2624_v52  ;;  %v3110_v52 = vpop.eup %3109 }
 0x4a3   : > { %v2625_v37 = vpop.f32.mrb[100].mxu0  ;;  %v1960_v11 = vpack.c.bf16 %v1937_v45, %v1936_v12  ;;  %v3112_v12 = vpop.eup %3111 }
 0x4a4   : > { %v2626_v49 = vpop.f32.mrb[101].mxu0 }
 0x4a5   : > { %v2627_v4 = vadd.f32 %v2626_v49, %v2625_v37  ;;  %v2628_v7 = vpop.f32.mrb[102].mxu0  ;;  %2771 = vmatprep.mubr.bf16.mxu1 %v1960_v11  ;;  %v1678_v37 = vpop.xlane.xlu1 %1677 }
 0x4a6   : > { %v2629_v15 = vpop.f32.mrb[103].mxu0  ;;  %3119 = vrcp.f32 %v1678_v37 }
 0x4a7   : > { %v2630_v41 = vadd.f32 %v2629_v15, %v2628_v7  ;;  %v1938_v21 = vmul.f32 %v3094_v58, %v2627_v4 }
 0x4a9   : > { %v1939_v3 = vmul.f32 %v3096_v33, %v2630_v41  ;;  %v3114_v41 = vpop.eup %3113 }
 0x4ab   : > { %v2631_v59 = vpop.f32.mrb[104].mxu0  ;;  %v1961_v18 = vpack.c.bf16 %v1939_v3, %v1938_v21  ;;  %v3116_v21 = vpop.eup %3115 }
 0x4ac   : > { %v2632_v26 = vpop.f32.mrb[105].mxu0 }
 0x4ad   : > { %v2633_v27 = vadd.f32 %v2632_v26, %v2631_v59  ;;  %v2634_v47 = vpop.f32.mrb[106].mxu0  ;;  %2772 = vmatmul.mubr.bf16.gmra.mrb[112].mxu1 %v1961_v18 }
 0x4ae   : > { %v2635_v8 = vpop.f32.mrb[107].mxu0 }
 0x4af   : > { %v2636_v29 = vadd.f32 %v2635_v8, %v2634_v47  ;;  %v1940_v53 = vmul.f32 %v3098_v14, %v2633_v27  ;;  %v3118_v8 = vpop.eup %3117 }
 0x4b1   : > { %v1941_v60 = vmul.f32 %v3100_v35, %v2636_v29  ;;  %v3120_v29 = vpop.eup %3119 }
 0x4b3   : > { %v2637_v17 = vpop.f32.mrb[108].mxu0  ;;  %v1962_v63 = vpack.c.bf16 %v1941_v60, %v1940_v53 }
 0x4b4   : > { %v2638_v40 = vpop.f32.mrb[109].mxu0 }
 0x4b5   : > { %v2639_v61 = vadd.f32 %v2638_v40, %v2637_v17  ;;  %v2640_v13 = vpop.f32.mrb[110].mxu0  ;;  %2775 = vmatprep.mubr.bf16.mxu1 %v1962_v63 }
 0x4b6   : > { %v2641_v48 = vpop.f32.mrb[111].mxu0 }
 0x4b7   : > { %v2642_v24 = vadd.f32 %v2641_v48, %v2640_v13  ;;  %v1942_v42 = vmul.f32 %v3102_v43, %v2639_v61  ;;  %v4418_v13 = vld [vmem:[#allocation16_spill] sm:$0xff] }
 0x4b9   : > { %v1943_v2 = vmul.f32 %v3104_v22, %v2642_v24  ;;  %v4419_v22 = vld [vmem:[#allocation17_spill] sm:$0xff] }
 0x4bb   : > { %v2643_v0 = vpop.f32.mrb[112].mxu0  ;;  %v1963_v54 = vpack.c.bf16 %v1943_v2, %v1942_v42 }
 0x4bc   : > { %v2644_v16 = vpop.f32.mrb[113].mxu0 }
 0x4bd   : > { %v2645_v56 = vadd.f32 %v2644_v16, %v2643_v0  ;;  %v2646_v55 = vpop.f32.mrb[114].mxu0  ;;  %2776 = vmatmul.mubr.bf16.gmra.mrb[116].mxu1 %v1963_v54  ;;  %v4421_v0 = vld [vmem:[#allocation19_spill] sm:$0xff] }
 0x4be   : > { %v2647_v62 = vpop.f32.mrb[115].mxu0 }
 0x4bf   : > { %v2648_v9 = vadd.f32 %v2647_v62, %v2646_v55  ;;  %v1944_v44 = vmul.f32 %v3106_v23, %v2645_v56 }
 0x4c1   : > { %v1945_v31 = vmul.f32 %v3108_v36, %v2648_v9  ;;  %v4422_v9 = vld [vmem:[#allocation20_spill] sm:$0xff] }
 0x4c3   : > { %v2649_v19 = vpop.f32.mrb[116].mxu0  ;;  %v1964_v39 = vpack.c.bf16 %v1945_v31, %v1944_v44 }
 0x4c4   : > { %v2650_v10 = vpop.f32.mrb[117].mxu0 }
 0x4c5   : > { %v2651_v38 = vadd.f32 %v2650_v10, %v2649_v19  ;;  %v2652_v28 = vpop.f32.mrb[118].mxu0  ;;  %2779 = vmatprep.mubr.bf16.mxu1 %v1964_v39  ;;  %v4424_v39 = vld [vmem:[#allocation22_spill] sm:$0xff] }
 0x4c6   : > { %v2653_v51 = vpop.f32.mrb[119].mxu0 }
 0x4c7   : > { %v2654_v46 = vadd.f32 %v2653_v51, %v2652_v28  ;;  %v1946_v45 = vmul.f32 %v3110_v52, %v2651_v38  ;;  %v4425_v38 = vld [vmem:[#allocation23_spill] sm:$0xff] }
 0x4c9   : > { %v1947_v34 = vmul.f32 %v3112_v12, %v2654_v46 }
 0x4cb   : > { %v2655_v11 = vpop.f32.mrb[120].mxu0  ;;  %v1965_v49 = vpack.c.bf16 %v1947_v34, %v1946_v45  ;;  %v4426_v34 = vld [vmem:[#allocation24_spill] sm:$0xff] }
 0x4cc   : > { %v2656_v4 = vpop.f32.mrb[121].mxu0 }
 0x4cd   : > { %v2657_v7 = vadd.f32 %v2656_v4, %v2655_v11  ;;  %v2658_v15 = vpop.f32.mrb[122].mxu0  ;;  %2780 = vmatmul.mubr.bf16.gmra.mrb[120].mxu1 %v1965_v49  ;;  %v4427_v49 = vld [vmem:[#allocation25_spill] sm:$0xff] }
 0x4ce   : > { %v2659_v58 = vpop.f32.mrb[123].mxu0 }
 0x4cf   : > { %v2660_v33 = vadd.f32 %v2659_v58, %v2658_v15  ;;  %v1948_v3 = vmul.f32 %v3114_v41, %v2657_v7  ;;  %v4428_v15 = vld [vmem:[#allocation26_spill] sm:$0xff]  ;;  %v4429_v41 = vld [vmem:[#allocation27_spill] sm:$0xff] }
 0x4d1   : > { %v1949_v6 = vmul.f32 %v3116_v21, %v2660_v33 }
 0x4d3   : > { %v2661_v20 = vpop.f32.mrb[124].mxu0  ;;  %v1966_v59 = vpack.c.bf16 %v1949_v6, %v1948_v3 }
 0x4d4   : > { %v2662_v18 = vpop.f32.mrb[125].mxu0 }
 0x4d5   : > { %v2663_v26 = vadd.f32 %v2662_v18, %v2661_v20  ;;  %v2664_v27 = vpop.f32.mrb[126].mxu0  ;;  %2783 = vmatprep.mubr.bf16.mxu1 %v1966_v59  ;;  %v4430_v18 = vld [vmem:[#allocation28_spill] sm:$0xff] }
 0x4d6   : > { %v2665_v47 = vpop.f32.mrb[127].mxu0 }
 0x4d7   : > { %v2666_v14 = vadd.f32 %v2665_v47, %v2664_v27  ;;  %v1950_v35 = vmul.f32 %v3118_v8, %v2663_v26  ;;  %v4431_v8 = vld [vmem:[#allocation29_spill] sm:$0xff] }
 0x4d9   : > { %v1951_v53 = vmul.f32 %v3120_v29, %v2666_v14 }
 0x4db   : > { %v1967_v60 = vpack.c.bf16 %v1951_v53, %v1950_v35  ;;  %v4432_v35 = vld [vmem:[#allocation30_spill] sm:$0xff] }
 0x4dd   : > { %2784 = vmatmul.mubr.bf16.gmra.mrb[124].mxu1 %v1967_v60  ;;  %v4433_v60 = vld [vmem:[#allocation31_spill] sm:$0xff] }
 0x540   : > { %v2757_v5 = vpop.f32.mrb[96].mxu1 }
 0x541   : > { %v2082_v17 = vadd.f32 %v2757_v5, %v4132_v1  ;;  %v2073_v63 = vpop.f32.mrb[97].mxu1 }
 0x542   : > { %v2074_v40 = vadd.f32 %v4132_v1, %v2073_v63  ;;  %v2758_v61 = vpop.f32.mrb[98].mxu1 }
 0x543   : > { %v2234_v48 = vadd.f32 %v4418_v13, %v2082_v17  ;;  %v2085_v43 = vadd.f32 %v2758_v61, %v4132_v1  ;;  %v2076_v24 = vpop.f32.mrb[99].mxu1 }
 0x544   : > { %v2232_v42 = vadd.f32 %v2074_v40, %v4419_v22  ;;  %v2077_v2 = vadd.f32 %v4132_v1, %v2076_v24 }
 0x545   : > { %2266 = vst [vmem:[%s4142_s23 + $0x10] sm:$0xff] %v2234_v48  ;;  %v2235_v32 = vadd.f32 %v4420_v50, %v2085_v43  ;;  %v4434_v48 = vld [vmem:[#allocation32_spill] sm:$0xff] }
 0x546   : > { %2264 = vst [vmem:[%s4142_s23] sm:$0xff] %v2232_v42  ;;  %v2233_v54 = vadd.f32 %v2077_v2, %v4421_v0  ;;  %v4435_v42 = vld [vmem:[#allocation33_spill] sm:$0xff] }
 0x547   : > { %2267 = vst [vmem:[%s4142_s23 + $0x18] sm:$0xff] %v2235_v32  ;;  %v4436_v32 = vld [vmem:[#allocation34_spill] sm:$0xff] }
 0x548   : > { %2265 = vst [vmem:[%s4142_s23 + $0x8] sm:$0xff] %v2233_v54  ;;  %v4437_v54 = vld [vmem:[#allocation35_spill] sm:$0xff] }
 0x550   : > { %v2761_v16 = vpop.f32.mrb[100].mxu1 }
 0x551   : > { %v2098_v56 = vadd.f32 %v2761_v16, %v4132_v1  ;;  %v2089_v55 = vpop.f32.mrb[101].mxu1 }
 0x552   : > { %v2090_v62 = vadd.f32 %v4132_v1, %v2089_v55  ;;  %v2762_v23 = vpop.f32.mrb[102].mxu1 }
 0x553   : > { %v2238_v36 = vadd.f32 %v4422_v9, %v2098_v56  ;;  %v2101_v44 = vadd.f32 %v2762_v23, %v4132_v1  ;;  %v2092_v31 = vpop.f32.mrb[103].mxu1 }
 0x554   : > { %v2236_v30 = vadd.f32 %v2090_v62, %v4423_v57  ;;  %v2093_v19 = vadd.f32 %v4132_v1, %v2092_v31 }
 0x555   : > { %2270 = vst [vmem:[%s4142_s23 + $0x30] sm:$0xff] %v2238_v36  ;;  %v2239_v10 = vadd.f32 %v4424_v39, %v2101_v44  ;;  %v4438_v36 = vld [vmem:[#allocation36_spill] sm:$0xff] }
 0x556   : > { %2268 = vst [vmem:[%s4142_s23 + $0x20] sm:$0xff] %v2236_v30  ;;  %v2237_v28 = vadd.f32 %v2093_v19, %v4425_v38  ;;  %v4439_v30 = vld [vmem:[#allocation37_spill] sm:$0xff] }
 0x557   : > { %2271 = vst [vmem:[%s4142_s23 + $0x38] sm:$0xff] %v2239_v10  ;;  %v4440_v10 = vld [vmem:[#allocation38_spill] sm:$0xff] }
 0x558   : > { %2269 = vst [vmem:[%s4142_s23 + $0x28] sm:$0xff] %v2237_v28  ;;  %v4441_v28 = vld [vmem:[#allocation39_spill] sm:$0xff] }
 0x560   : > { %v2765_v51 = vpop.f32.mrb[104].mxu1 }
 0x561   : > { %v2114_v52 = vadd.f32 %v2765_v51, %v4132_v1  ;;  %v2105_v46 = vpop.f32.mrb[105].mxu1 }
 0x562   : > { %v2106_v12 = vadd.f32 %v4132_v1, %v2105_v46  ;;  %v2766_v45 = vpop.f32.mrb[106].mxu1 }
 0x563   : > { %v2242_v25 = vadd.f32 %v4426_v34, %v2114_v52  ;;  %v2117_v37 = vadd.f32 %v2766_v45, %v4132_v1  ;;  %v2108_v11 = vpop.f32.mrb[107].mxu1 }
 0x564   : > { %v2240_v4 = vadd.f32 %v2106_v12, %v4427_v49  ;;  %v2109_v7 = vadd.f32 %v4132_v1, %v2108_v11 }
 0x565   : > { %2274 = vst [vmem:[%s4142_s23 + $0x50] sm:$0xff] %v2242_v25  ;;  %v2243_v58 = vadd.f32 %v4428_v15, %v2117_v37  ;;  %v4442_v25 = vld [vmem:[#allocation40_spill] sm:$0xff] }
 0x566   : > { %2272 = vst [vmem:[%s4142_s23 + $0x40] sm:$0xff] %v2240_v4  ;;  %v2241_v33 = vadd.f32 %v2109_v7, %v4429_v41  ;;  %v4443_v4 = vld [vmem:[#allocation41_spill] sm:$0xff] }
 0x567   : > { %2275 = vst [vmem:[%s4142_s23 + $0x58] sm:$0xff] %v2243_v58  ;;  %v4444_v58 = vld [vmem:[#allocation42_spill] sm:$0xff] }
 0x568   : > { %2273 = vst [vmem:[%s4142_s23 + $0x48] sm:$0xff] %v2241_v33  ;;  %v4445_v33 = vld [vmem:[#allocation43_spill] sm:$0xff] }
 0x570   : > { %v2769_v21 = vpop.f32.mrb[108].mxu1 }
 0x571   : > { %v2130_v3 = vadd.f32 %v2769_v21, %v4132_v1  ;;  %v2121_v6 = vpop.f32.mrb[109].mxu1 }
 0x572   : > { %v2122_v20 = vadd.f32 %v4132_v1, %v2121_v6  ;;  %v2770_v59 = vpop.f32.mrb[110].mxu1 }
 0x573   : > { %v2246_v26 = vadd.f32 %v4430_v18, %v2130_v3  ;;  %v2133_v27 = vadd.f32 %v2770_v59, %v4132_v1  ;;  %v2124_v47 = vpop.f32.mrb[111].mxu1 }
 0x574   : > { %v2244_v14 = vadd.f32 %v2122_v20, %v4431_v8  ;;  %v2125_v29 = vadd.f32 %v4132_v1, %v2124_v47 }
 0x575   : > { %2278 = vst [vmem:[%s4142_s23 + $0x70] sm:$0xff] %v2246_v26  ;;  %v2247_v53 = vadd.f32 %v4432_v35, %v2133_v27  ;;  %v4446_v26 = vld [vmem:[#allocation44_spill] sm:$0xff] }
 0x576   : > { %2276 = vst [vmem:[%s4142_s23 + $0x60] sm:$0xff] %v2244_v14  ;;  %v2245_v5 = vadd.f32 %v2125_v29, %v4433_v60  ;;  %v4447_v14 = vld [vmem:[#allocation45_spill] sm:$0xff] }
 0x577   : > { %2279 = vst [vmem:[%s4142_s23 + $0x78] sm:$0xff] %v2247_v53  ;;  %v4448_v53 = vld [vmem:[#allocation46_spill] sm:$0xff] }
 0x578   : > { %2277 = vst [vmem:[%s4142_s23 + $0x68] sm:$0xff] %v2245_v5  ;;  %v4449_v5 = vld [vmem:[#allocation47_spill] sm:$0xff] }
 0x580   : > { %v2773_v17 = vpop.f32.mrb[112].mxu1 }
 0x581   : > { %v2146_v63 = vadd.f32 %v2773_v17, %v4132_v1  ;;  %v2137_v40 = vpop.f32.mrb[113].mxu1 }
 0x582   : > { %v2138_v61 = vadd.f32 %v4132_v1, %v2137_v40  ;;  %v2774_v13 = vpop.f32.mrb[114].mxu1 }
 0x583   : > { %v2250_v43 = vadd.f32 %v4434_v48, %v2146_v63  ;;  %v2149_v24 = vadd.f32 %v2774_v13, %v4132_v1  ;;  %v2140_v22 = vpop.f32.mrb[115].mxu1 }
 0x584   : > { %v2248_v2 = vadd.f32 %v2138_v61, %v4435_v42  ;;  %v2141_v50 = vadd.f32 %v4132_v1, %v2140_v22 }
 0x585   : > { %2282 = vst [vmem:[%s4142_s23 + $0x90] sm:$0xff] %v2250_v43  ;;  %v2251_v0 = vadd.f32 %v4436_v32, %v2149_v24 }
 0x586   : > { %2280 = vst [vmem:[%s4142_s23 + $0x80] sm:$0xff] %v2248_v2  ;;  %v2249_v16 = vadd.f32 %v2141_v50, %v4437_v54 }
 0x587   : > { %2283 = vst [vmem:[%s4142_s23 + $0x98] sm:$0xff] %v2251_v0 }
 0x588   : > { %2281 = vst [vmem:[%s4142_s23 + $0x88] sm:$0xff] %v2249_v16 }
 0x590   : > { %v2777_v56 = vpop.f32.mrb[116].mxu1 }
 0x591   : > { %v2162_v55 = vadd.f32 %v2777_v56, %v4132_v1  ;;  %v2153_v62 = vpop.f32.mrb[117].mxu1 }
 0x592   : > { %v2154_v23 = vadd.f32 %v4132_v1, %v2153_v62  ;;  %v2778_v9 = vpop.f32.mrb[118].mxu1 }
 0x593   : > { %v2254_v44 = vadd.f32 %v4438_v36, %v2162_v55  ;;  %v2165_v31 = vadd.f32 %v2778_v9, %v4132_v1  ;;  %v2156_v57 = vpop.f32.mrb[119].mxu1 }
 0x594   : > { %v2252_v19 = vadd.f32 %v2154_v23, %v4439_v30  ;;  %v2157_v39 = vadd.f32 %v4132_v1, %v2156_v57 }
 0x595   : > { %2286 = vst [vmem:[%s4142_s23 + $0xb0] sm:$0xff] %v2254_v44  ;;  %v2255_v38 = vadd.f32 %v4440_v10, %v2165_v31 }
 0x596   : > { %2284 = vst [vmem:[%s4142_s23 + $0xa0] sm:$0xff] %v2252_v19  ;;  %v2253_v51 = vadd.f32 %v2157_v39, %v4441_v28 }
 0x597   : > { %2287 = vst [vmem:[%s4142_s23 + $0xb8] sm:$0xff] %v2255_v38 }
 0x598   : > { %2285 = vst [vmem:[%s4142_s23 + $0xa8] sm:$0xff] %v2253_v51 }
 0x5a0   : > { %v2781_v52 = vpop.f32.mrb[120].mxu1 }
 0x5a1   : > { %v2178_v46 = vadd.f32 %v2781_v52, %v4132_v1  ;;  %v2169_v12 = vpop.f32.mrb[121].mxu1 }
 0x5a2   : > { %v2170_v45 = vadd.f32 %v4132_v1, %v2169_v12  ;;  %v2782_v34 = vpop.f32.mrb[122].mxu1 }
 0x5a3   : > { %v2258_v37 = vadd.f32 %v4442_v25, %v2178_v46  ;;  %v2181_v11 = vadd.f32 %v2782_v34, %v4132_v1  ;;  %v2172_v49 = vpop.f32.mrb[123].mxu1 }
 0x5a4   : > { %v2256_v7 = vadd.f32 %v2170_v45, %v4443_v4  ;;  %v2173_v15 = vadd.f32 %v4132_v1, %v2172_v49 }
 0x5a5   : > { %2290 = vst [vmem:[%s4142_s23 + $0xd0] sm:$0xff] %v2258_v37  ;;  %v2259_v41 = vadd.f32 %v4444_v58, %v2181_v11 }
 0x5a6   : > { %2288 = vst [vmem:[%s4142_s23 + $0xc0] sm:$0xff] %v2256_v7  ;;  %v2257_v21 = vadd.f32 %v2173_v15, %v4445_v33 }
 0x5a7   : > { %2291 = vst [vmem:[%s4142_s23 + $0xd8] sm:$0xff] %v2259_v41 }
 0x5a8   : > { %2289 = vst [vmem:[%s4142_s23 + $0xc8] sm:$0xff] %v2257_v21 }
 0x5b0   : > { %v2785_v3 = vpop.f32.mrb[124].mxu1 }
 0x5b1   : > { %v2194_v6 = vadd.f32 %v2785_v3, %v4132_v1  ;;  %v2185_v20 = vpop.f32.mrb[125].mxu1 }
 0x5b2   : > { %v2186_v59 = vadd.f32 %v4132_v1, %v2185_v20  ;;  %v2786_v18 = vpop.f32.mrb[126].mxu1 }
 0x5b3   : > { %v2262_v27 = vadd.f32 %v4446_v26, %v2194_v6  ;;  %v2197_v47 = vadd.f32 %v2786_v18, %v4132_v1  ;;  %v2188_v8 = vpop.f32.mrb[127].mxu1 }
 0x5b4   : > { %v2260_v29 = vadd.f32 %v2186_v59, %v4447_v14  ;;  %v2189_v35 = vadd.f32 %v4132_v1, %v2188_v8 }
 0x5b5   : > { %2294 = vst [vmem:[%s4142_s23 + $0xf0] sm:$0xff] %v2262_v27  ;;  %v2263_v60 = vadd.f32 %v4448_v53, %v2197_v47 }
 0x5b6   : > { %2292 = vst [vmem:[%s4142_s23 + $0xe0] sm:$0xff] %v2260_v29  ;;  %v2261_v17 = vadd.f32 %v2189_v35, %v4449_v5 }
 0x5b7   : > { %2295 = vst [vmem:[%s4142_s23 + $0xf8] sm:$0xff] %v2263_v60 }
 0x5b8   : > { %2293 = vst [vmem:[%s4142_s23 + $0xe8] sm:$0xff] %v2261_v17 }
 0x5b9   : > { %3248 = shalt.err (!%p3245_p0)
}
 0x5ba   : > { %s3249_s24 = scalar_lea.hbm %s4235_s22, 4096  ;;  %s3253_s30 = scalar_lea.hbm %s4294_s4, 8192 }
 0x5bb   : > { %p3250_p4 = scmp.ne.s32.totalorder %s4235_s22, %s3249_s24  ;;  %p3254_p12 = scmp.lt.u32.totalorder %s4235_s22, %s4294_s4 }
 0x5bc   : > { %p3255_p1 = scmp.lt.u32.totalorder %s3253_s30, %s3249_s24  ;;  %p3257_p13 = scmp.lt.u32.totalorder %s3249_s24, %s4235_s22 }
 0x5bd   : > { %p3251_p8 = pnand %p3250_p4, %p3520_p3 }
 0x5be   : > { %p3256_p7 = por %p3255_p1, %p3254_p12 }
 0x5bf   : > { %p3252_p2 = pneg %p3251_p8 }
 0x5c0   : > { %p3258_p6 = por %p3257_p13, %p3256_p7 }
 0x5c2   : > { %p3259_p10 = pnand %p3258_p6, %p3252_p2 }
 0x5c4   : > { %3262 = shalt.err (!%p3259_p10)
}
 0x5c5   : > { %s3339_s23 = smov 128   ;;  %s3340_s25 = smov 8  }
 0x5c6   : > { %2801 = dma.vmem_to_hbm [thread:$0]  (%p3520_p3), %s4237_s27, 4096, %s4235_s22, %s2297_s18, %s3339_s23, %s3339_s23, %s3340_s25  }
 0x5c7 PF: > { %s2327_s29 = sand.u32 1, %s3305_s15   ;;  %p4450_p11 = scmp.ne.s32.totalorder %s4348_s26, 0 }
 0x5c8   : > { %p4451_p5 = scmp.ge.s32.totalorder %s3325_s20, 2  ;;  %s2328_s6 = scalar_lea.sflag [#allocation5], %s2327_s29 }
 0x5ca   : > { %p2818_p9 = pnand %p4451_p5, %p4450_p11 }
 0x5cc   : > { %3300 = dma.done.wait (!%p2818_p9), %s2328_s6, 4096  }
 0x5cd   : > { %3302 = vsyncadd (!%p2818_p9), %s2328_s6, 4294963200  ;;  %s22_s20 = sadd.s32 1, %s3325_s20   ;;  %s4452_s15 = smov %s3309_s16 }
 0x5ce   : > { %p19_p0 = scmp.ge.s32.totalorder %s22_s20, 4   ;;  %s4453_s16 = smov %s3313_s17 }
 0x5cf   : > { %s4454_s17 = smov %s3529_s11  ;;  %s4455_s18 = smov %s3321_s19 }
 0x5d0   : > { %s4456_s19 = smov %s4458_s1  ;;  %21 = sbr.rel (!%p19_p0) target bundleno = 10 (0xa), region = 98 }
 0x5d7   :  { %2333 = vsyncpa [#allocation4], 1 }
 0x5d8   :  { %2335 = vsyncpa [#allocation4 + $0x1], 1 }
 0x5d9   :  { %2336 = vsyncpa [#allocation7], 1 }
 0x5da   :  { %2337 = vsyncpa [#allocation10], 1 }
 0x5db   :  { %2338 = vsyncpa [#allocation5], 1 }
 0x5dc   :  { %2340 = vsyncpa [#allocation5 + $0x1], 1 }

</bundles_post_ra>
